<compile_context>
chip_gen: v6e
topology: v6e:2x2x1
jax: 0.10.0
libtpu: 0.0.40
codegen_flags: <defaults>
</compile_context>

<pallas_src>
import jax
import jax.numpy as jnp
from jax.experimental import pallas as pl
from jax.experimental.pallas import tpu as pltpu

IN_FEATURES = 3072
HIDDEN = 512
NUM_CLASSES = 10
OUT_PAD = 128          # pad final lane dim 10 -> 128 for lane-dense output stores
TK = 1536              # 3072 = 2 * 1536 -> only 2 K steps streaming W1
MAX_TM = 256           # batch tile (MXU-friendly, bounds VMEM independent of B)


def _round_up(n, m):
    return ((n + m - 1) // m) * m


# ---------------------------------------------------------------------------
# Fused kernel.  Grid = (M tiles, K tiles); K (reduction over the 3072 input
# features of layer 1) is innermost.  Layers 2 & 3 run in the finalize branch
# with everything (activations, W2, W3) resident in VMEM.
# ---------------------------------------------------------------------------
def fcn_fused_kernel(x_ref, w1_ref, b1_ref, w2_ref, b2_ref, w3_ref, b3_ref,
                     o_ref, acc_ref):
    k = pl.program_id(1)

    @pl.when(k == 0)
    def _init():
        acc_ref[...] = jnp.zeros_like(acc_ref)

    # Layer-1 partial matmul on streamed (TM, TK) x (TK, 512) bf16 tiles,
    # accumulated in f32 VMEM scratch while the next W1 tile is DMA'd.
    acc_ref[...] += jnp.dot(x_ref[...], w1_ref[...],
                            preferred_element_type=jnp.float32)

    @pl.when(k == pl.num_programs(1) - 1)
    def _finalize():
        h1 = jnp.maximum(acc_ref[...] + b1_ref[...], 0.0)               # relu(fc1)
        h2 = jnp.dot(h1.astype(jnp.bfloat16), w2_ref[...],
                     preferred_element_type=jnp.float32)
        h2 = jnp.maximum(h2 + b2_ref[...], 0.0)                         # relu(fc2)
        y = jnp.dot(h2.astype(jnp.bfloat16), w3_ref[...],
                    preferred_element_type=jnp.float32)
        o_ref[...] = y + b3_ref[...]                                    # fc (padded)


# ---------------------------------------------------------------------------
# One-time parameter preparation (bf16 cast + lane-padding of the classifier).
# Done once, NOT per forward call.
# ---------------------------------------------------------------------------
def prepare_params(params):
    (w1, b1), (w2, b2), (w3, b3) = params
    w3p = jnp.zeros((HIDDEN, OUT_PAD), jnp.float32).at[:, :NUM_CLASSES].set(w3)
    b3p = jnp.zeros((1, OUT_PAD), jnp.float32).at[0, :NUM_CLASSES].set(b3)
    return {
        "w1": w1.astype(jnp.bfloat16),
        "b1": b1.reshape(1, -1).astype(jnp.float32),
        "w2": w2.astype(jnp.bfloat16),
        "b2": b2.reshape(1, -1).astype(jnp.float32),
        "w3": w3p.astype(jnp.bfloat16),
        "b3": b3p,
    }


# ---------------------------------------------------------------------------
# Wrapper (implements FCN_WOBN.forward for the default num_layers=3)
# ---------------------------------------------------------------------------
def fcn_forward(prep, x):
    B = x.shape[0]
    xf = x.reshape(B, -1)                               # x.view(B, -1)
    assert xf.shape[1] == IN_FEATURES, xf.shape
    xf = xf.astype(jnp.bfloat16)

    # Batch tiling: TM <= 256, padded to a multiple of TM (and of 8 sublanes).
    tm = min(MAX_TM, _round_up(B, 8))
    b_pad = _round_up(B, tm)
    if b_pad != B:
        xf = jnp.pad(xf, ((0, b_pad - B), (0, 0)))

    n_m = b_pad // tm
    n_k = IN_FEATURES // TK

    out_padded = pl.pallas_call(
        fcn_fused_kernel,
        out_shape=jax.ShapeDtypeStruct((b_pad, OUT_PAD), jnp.float32),
        grid_spec=pltpu.PrefetchScalarGridSpec(
            num_scalar_prefetch=0,
            grid=(n_m, n_k),                                    # K innermost
            in_specs=[
                pl.BlockSpec((tm, TK), lambda m, k: (m, k)),          # x tile
                pl.BlockSpec((TK, HIDDEN), lambda m, k: (k, 0)),      # W1 tile (streamed)
                pl.BlockSpec((1, HIDDEN), lambda m, k: (0, 0)),       # b1 (resident)
                pl.BlockSpec((HIDDEN, HIDDEN), lambda m, k: (0, 0)),  # W2 (resident)
                pl.BlockSpec((1, HIDDEN), lambda m, k: (0, 0)),       # b2 (resident)
                pl.BlockSpec((HIDDEN, OUT_PAD), lambda m, k: (0, 0)), # W3 padded
                pl.BlockSpec((1, OUT_PAD), lambda m, k: (0, 0)),      # b3 padded
            ],
            out_specs=pl.BlockSpec((tm, OUT_PAD), lambda m, k: (m, 0)),
            scratch_shapes=[pltpu.VMEM((tm, HIDDEN), jnp.float32)],   # layer-1 acc
        ),
        compiler_params=pltpu.CompilerParams(
            dimension_semantics=("parallel", "arbitrary")),
    )(xf, prep["w1"], prep["b1"], prep["w2"], prep["b2"],
      prep["w3"], prep["b3"])

    return out_padded[:B, :NUM_CLASSES]


# ---------------------------------------------------------------------------
# Parameter initialization (mirrors nn.Linear defaults; W stored as (in, out))
# ---------------------------------------------------------------------------
def init_linear(key, in_c, out_c):
    kw, kb = jax.random.split(key)
    bound = 1.0 / jnp.sqrt(jnp.float32(in_c))
    w = jax.random.uniform(kw, (in_c, out_c), jnp.float32, -bound, bound)
    b = jax.random.uniform(kb, (out_c,), jnp.float32, -bound, bound)
    return w, b


def init_fcn_params(key):
    # Default num_layers=3: Linear(3072,512), Linear(512,512), fc=Linear(512,10).
    k1, k2, k3 = jax.random.split(key, 3)
    return [
        init_linear(k1, IN_FEATURES, HIDDEN),
        init_linear(k2, HIDDEN, HIDDEN),
        init_linear(k3, HIDDEN, NUM_CLASSES),
    ]


if __name__ == "__main__":
    key = jax.random.PRNGKey(0)
    k_param, k_x = jax.random.split(key)

    params = init_fcn_params(k_param)
    prep = prepare_params(params)          # one-time: bf16 cast + W3/b3 padding

    # Input must flatten to 3072 features: (B, 3, 32, 32).
    x = jax.random.normal(k_x, (2, 3, 32, 32), jnp.float32)

    out = fcn_forward(prep, x)
    out = jax.block_until_ready(out)
    assert out.shape == (2, NUM_CLASSES), out.shape

    # Reference 1: pure-JAX forward with the SAME bf16 casts (tight check of
    # the kernel itself).
    xf = x.reshape(2, -1)
    (w1, b1), (w2, b2), (w3, b3) = params
    h = jnp.dot(xf.astype(jnp.bfloat16), w1.astype(jnp.bfloat16),
                preferred_element_type=jnp.float32) + b1
    h = jnp.maximum(h, 0.0)
    h = jnp.dot(h.astype(jnp.bfloat16), w2.astype(jnp.bfloat16),
                preferred_element_type=jnp.float32) + b2
    h = jnp.maximum(h, 0.0)
    ref_bf16 = jnp.dot(h.astype(jnp.bfloat16), w3.astype(jnp.bfloat16),
                       preferred_element_type=jnp.float32) + b3
    assert jnp.allclose(out, ref_bf16, atol=2e-3, rtol=2e-3), (
        float(jnp.max(jnp.abs(out - ref_bf16))))

    # Reference 2: f32 forward (module semantics) — looser tolerance since the
    # kernel intentionally uses bf16 weights/activations with f32 accumulation.
    ref_f32 = jnp.maximum(xf @ w1 + b1, 0.0)
    ref_f32 = jnp.maximum(ref_f32 @ w2 + b2, 0.0)
    ref_f32 = ref_f32 @ w3 + b3
    assert jnp.allclose(out, ref_f32, atol=5e-2, rtol=5e-2), (
        float(jnp.max(jnp.abs(out - ref_f32))))

    print("KERNEL_OK")
</pallas_src>

<mosaic_0001>
module attributes {stable_mosaic.version = 11 : i64} {
  func.func @fcn_fused_kernel(%arg0: i32, %arg1: i32, %arg2: memref<8x1536xbf16, #tpu.memory_space<vmem>>, %arg3: memref<1536x512xbf16, #tpu.memory_space<vmem>>, %arg4: memref<1x512xf32, #tpu.memory_space<vmem>>, %arg5: memref<512x512xbf16, #tpu.memory_space<vmem>>, %arg6: memref<1x512xf32, #tpu.memory_space<vmem>>, %arg7: memref<512x128xbf16, #tpu.memory_space<vmem>>, %arg8: memref<1x128xf32, #tpu.memory_space<vmem>>, %arg9: memref<8x128xf32, #tpu.memory_space<vmem>>, %arg10: memref<8x512xf32, #tpu.memory_space<vmem>>) attributes {dimension_semantics = [#tpu.dimension_semantics<parallel>, #tpu.dimension_semantics<arbitrary>], iteration_bounds = array<i64: 1, 2>, scalar_prefetch = 0 : i64, scratch_operands = 1 : i64, tpu.core_type = #tpu.core_type<tc>, window_params = [{transform_indices = @transform_0, window_bounds = array<i64: 8, 1536>}, {transform_indices = @transform_1, window_bounds = array<i64: 1536, 512>}, {pipeline_mode = #tpu.pipeline_mode<synchronous>, transform_indices = @transform_2, window_bounds = array<i64: 1, 512>}, {pipeline_mode = #tpu.pipeline_mode<synchronous>, transform_indices = @transform_3, window_bounds = array<i64: 512, 512>}, {pipeline_mode = #tpu.pipeline_mode<synchronous>, transform_indices = @transform_4, window_bounds = array<i64: 1, 512>}, {pipeline_mode = #tpu.pipeline_mode<synchronous>, transform_indices = @transform_5, window_bounds = array<i64: 512, 128>}, {pipeline_mode = #tpu.pipeline_mode<synchronous>, transform_indices = @transform_6, window_bounds = array<i64: 1, 128>}, {transform_indices = @transform_7, window_bounds = array<i64: 8, 128>}]} {
    %c0_i32 = arith.constant 0 : i32
    %0 = arith.cmpi eq, %arg1, %c0_i32 : i32
    %1 = arith.extui %0 : i1 to i32
    %c0_i32_0 = arith.constant 0 : i32
    %2 = arith.cmpi ne, %1, %c0_i32_0 : i32
    scf.if %2 {
      %cst_9 = arith.constant 0.000000e+00 : f32
      %12 = vector.broadcast %cst_9 : f32 to vector<8x512xf32>
      %c0_10 = arith.constant 0 : index
      %c0_11 = arith.constant 0 : index
      %13 = vector.load %arg10[%c0_10, %c0_11] : memref<8x512xf32, #tpu.memory_space<vmem>>, vector<8x512xf32>
      tpu.vector_store %arg10[%c0_10, %c0_11], %12 {strides = array<i32>} : memref<8x512xf32, #tpu.memory_space<vmem>>, vector<8x512xf32>,
    } else {
    }
    %c0 = arith.constant 0 : index
    %c0_1 = arith.constant 0 : index
    %3 = vector.load %arg10[%c0, %c0_1] : memref<8x512xf32, #tpu.memory_space<vmem>>, vector<8x512xf32>
    %c0_2 = arith.constant 0 : index
    %c0_3 = arith.constant 0 : index
    %4 = vector.load %arg2[%c0_2, %c0_3] : memref<8x1536xbf16, #tpu.memory_space<vmem>>, vector<8x1536xbf16>
    %c0_4 = arith.constant 0 : index
    %c0_5 = arith.constant 0 : index
    %5 = vector.load %arg3[%c0_4, %c0_5] : memref<1536x512xbf16, #tpu.memory_space<vmem>>, vector<1536x512xbf16>
    %cst = arith.constant dense<0.000000e+00> : vector<8x512xf32>
    %6 = tpu.matmul %4, %5, %cst {dimension_numbers = #tpu.dot_dimension_numbers<[1], [0], [0], [1], [0, 0, 1, 1], [], []>} : vector<8x1536xbf16>, vector<1536x512xbf16>, vector<8x512xf32> -> vector<8x512xf32>
    %7 = arith.addf %3, %6 : vector<8x512xf32>
    %c0_6 = arith.constant 0 : index
    %c0_7 = arith.constant 0 : index
    %8 = vector.load %arg10[%c0_6, %c0_7] : memref<8x512xf32, #tpu.memory_space<vmem>>, vector<8x512xf32>
    tpu.vector_store %arg10[%c0_6, %c0_7], %7 {strides = array<i32>} : memref<8x512xf32, #tpu.memory_space<vmem>>, vector<8x512xf32>,
    %c1_i32 = arith.constant 1 : i32
    %9 = arith.cmpi eq, %arg1, %c1_i32 : i32
    %10 = arith.extui %9 : i1 to i32
    %c0_i32_8 = arith.constant 0 : i32
    %11 = arith.cmpi ne, %10, %c0_i32_8 : i32
    scf.if %11 {
      %c0_9 = arith.constant 0 : index
      %c0_10 = arith.constant 0 : index
      %12 = vector.load %arg10[%c0_9, %c0_10] : memref<8x512xf32, #tpu.memory_space<vmem>>, vector<8x512xf32>
      %c0_11 = arith.constant 0 : index
      %c0_12 = arith.constant 0 : index
      %13 = vector.load %arg4[%c0_11, %c0_12] : memref<1x512xf32, #tpu.memory_space<vmem>>, vector<1x512xf32>
      %14 = vector.broadcast %13 : vector<1x512xf32> to vector<8x512xf32>
      %15 = arith.addf %12, %14 : vector<8x512xf32>
      %cst_13 = arith.constant 0.000000e+00 : f32
      %16 = vector.broadcast %cst_13 : f32 to vector<8x512xf32>
      %17 = arith.maximumf %15, %16 : vector<8x512xf32>
      %18 = arith.truncf %17 : vector<8x512xf32> to vector<8x512xbf16>
      %c0_14 = arith.constant 0 : index
      %c0_15 = arith.constant 0 : index
      %19 = vector.load %arg5[%c0_14, %c0_15] : memref<512x512xbf16, #tpu.memory_space<vmem>>, vector<512x512xbf16>
      %cst_16 = arith.constant dense<0.000000e+00> : vector<8x512xf32>
      %20 = tpu.matmul %18, %19, %cst_16 {dimension_numbers = #tpu.dot_dimension_numbers<[1], [0], [0], [1], [0, 0, 1, 1], [], []>} : vector<8x512xbf16>, vector<512x512xbf16>, vector<8x512xf32> -> vector<8x512xf32>
      %c0_17 = arith.constant 0 : index
      %c0_18 = arith.constant 0 : index
      %21 = vector.load %arg6[%c0_17, %c0_18] : memref<1x512xf32, #tpu.memory_space<vmem>>, vector<1x512xf32>
      %22 = vector.broadcast %21 : vector<1x512xf32> to vector<8x512xf32>
      %23 = arith.addf %20, %22 : vector<8x512xf32>
      %cst_19 = arith.constant 0.000000e+00 : f32
      %24 = vector.broadcast %cst_19 : f32 to vector<8x512xf32>
      %25 = arith.maximumf %23, %24 : vector<8x512xf32>
      %26 = arith.truncf %25 : vector<8x512xf32> to vector<8x512xbf16>
      %c0_20 = arith.constant 0 : index
      %c0_21 = arith.constant 0 : index
      %27 = vector.load %arg7[%c0_20, %c0_21] : memref<512x128xbf16, #tpu.memory_space<vmem>>, vector<512x128xbf16>
      %cst_22 = arith.constant dense<0.000000e+00> : vector<8x128xf32>
      %28 = tpu.matmul %26, %27, %cst_22 {dimension_numbers = #tpu.dot_dimension_numbers<[1], [0], [0], [1], [0, 0, 1, 1], [], []>} : vector<8x512xbf16>, vector<512x128xbf16>, vector<8x128xf32> -> vector<8x128xf32>
      %c0_23 = arith.constant 0 : index
      %c0_24 = arith.constant 0 : index
      %29 = vector.load %arg8[%c0_23, %c0_24] : memref<1x128xf32, #tpu.memory_space<vmem>>, vector<1x128xf32>
      %30 = vector.broadcast %29 : vector<1x128xf32> to vector<8x128xf32>
      %31 = arith.addf %28, %30 : vector<8x128xf32>
      %c0_25 = arith.constant 0 : index
      %c0_26 = arith.constant 0 : index
      %32 = vector.load %arg9[%c0_25, %c0_26] : memref<8x128xf32, #tpu.memory_space<vmem>>, vector<8x128xf32>
      tpu.vector_store %arg9[%c0_25, %c0_26], %31 {strides = array<i32>} : memref<8x128xf32, #tpu.memory_space<vmem>>, vector<8x128xf32>,
    } else {
    }
    return
  }
  func.func @transform_0(%arg0: i32, %arg1: i32) -> (i32, i32) {
    %c0_i32 = arith.constant 0 : i32
    return %arg0, %arg1 : i32, i32
  }
  func.func @transform_1(%arg0: i32, %arg1: i32) -> (i32, i32) {
    %c0_i32 = arith.constant 0 : i32
    %c0_i32_0 = arith.constant 0 : i32
    return %arg1, %c0_i32 : i32, i32
  }
  func.func @transform_2(%arg0: i32, %arg1: i32) -> (i32, i32) {
    %c0_i32 = arith.constant 0 : i32
    %c0_i32_0 = arith.constant 0 : i32
    %c0_i32_1 = arith.constant 0 : i32
    return %c0_i32, %c0_i32_0 : i32, i32
  }
  func.func @transform_3(%arg0: i32, %arg1: i32) -> (i32, i32) {
    %c0_i32 = arith.constant 0 : i32
    %c0_i32_0 = arith.constant 0 : i32
    %c0_i32_1 = arith.constant 0 : i32
    return %c0_i32, %c0_i32_0 : i32, i32
  }
  func.func @transform_4(%arg0: i32, %arg1: i32) -> (i32, i32) {
    %c0_i32 = arith.constant 0 : i32
    %c0_i32_0 = arith.constant 0 : i32
    %c0_i32_1 = arith.constant 0 : i32
    return %c0_i32, %c0_i32_0 : i32, i32
  }
  func.func @transform_5(%arg0: i32, %arg1: i32) -> (i32, i32) {
    %c0_i32 = arith.constant 0 : i32
    %c0_i32_0 = arith.constant 0 : i32
    %c0_i32_1 = arith.constant 0 : i32
    return %c0_i32, %c0_i32_0 : i32, i32
  }
  func.func @transform_6(%arg0: i32, %arg1: i32) -> (i32, i32) {
    %c0_i32 = arith.constant 0 : i32
    %c0_i32_0 = arith.constant 0 : i32
    %c0_i32_1 = arith.constant 0 : i32
    return %c0_i32, %c0_i32_0 : i32, i32
  }
  func.func @transform_7(%arg0: i32, %arg1: i32) -> (i32, i32) {
    %c0_i32 = arith.constant 0 : i32
    %c0_i32_0 = arith.constant 0 : i32
    return %arg0, %c0_i32 : i32, i32
  }
}

</mosaic_0001>

<bundles_post_ra>
// kernel: tpu_custom_call.1
= control target key start
LH: loop header
LB: loop body
LE: loop exit
PB: predicated region body
PF: predicated region fallthrough
CT: control target
= control target key end

     0   :  { %s7383_s0 = inlined_call_operand.hbm [shape: bf16[8,3072], index: 0, kind: input, shape index: {}]   ;;  %s7384_s1 = inlined_call_operand.hbm [shape: bf16[3072,512], index: 1, kind: input, shape index: {}]   ;;  %s7385_s2 = inlined_call_operand.hbm [shape: f32[1,512], index: 2, kind: input, shape index: {}]   ;;  %s7386_s3 = inlined_call_operand.hbm [shape: bf16[512,512], index: 3, kind: input, shape index: {}]   ;;  %s7387_s4 = inlined_call_operand.hbm [shape: f32[1,512], index: 4, kind: input, shape index: {}]   ;;  %s7388_s5 = inlined_call_operand.hbm [shape: bf16[512,128], index: 5, kind: input, shape index: {}]   ;;  %s7389_s6 = inlined_call_operand.hbm [shape: f32[1,128], index: 6, kind: input, shape index: {}]   ;;  %s7390_s7 = inlined_call_operand.hbm [shape: f32[8,128], index: 7, kind: output, shape index: {}]  }
   0x1   :  { %7395 = sst [smem:[#allocation22_spill]] %s7383_s0 }
   0x2   :  { %7396 = sst [smem:[#allocation23_spill]] %s7385_s2 }
   0x3   :  { %7397 = sst [smem:[#allocation24_spill]] %s7386_s3 }
   0x4   :  { %12 = vsyncpa [#allocation4], 0 }
   0x5   :  { %14 = vsyncpa [#allocation4 + $0x1], 0 }
   0x6   :  { %15 = vsyncpa [#allocation7], 0 }
   0x7   :  { %17 = vsyncpa [#allocation7 + $0x1], 0 }
   0x8   :  { %18 = vsyncpa [#allocation10], 0 }
   0x9   :  { %19 = vsyncpa [#allocation13], 0 }
   0xa   :  { %20 = vsyncpa [#allocation5], 0  ;;  %s6671_s24 = smov 0   ;;  %s6673_s25 = smov 0  }
   0xb   :  { %s6675_s26 = smov 0   ;;  %s6677_s27 = smov 0  }
   0xc   :  { %s6679_s28 = smov 0   ;;  %s6681_s29 = smov 0  }
   0xd LB: > { %s6702_s30 = sadd.s32 4294967295, %s6616_s29   ;;  %p4770_p0 = scmp.ge.s32.totalorder %s6616_s29, 1  ;;  %s6616_s29 = sphi %s6681_s29, %s26_s29   ;;  %s6612_s28 = sphi %s6679_s28, %s7420_s28   ;;  %s6608_s27 = sphi %s6677_s27, %s7419_s27   ;;  %s6604_s26 = sphi %s6675_s26, %s7418_s26   ;;  %s6600_s25 = sphi %s6673_s25, %s7417_s25   ;;  %s6596_s24 = sphi %s6671_s24, %s7416_s24  }
   0xe   : > { %p7391_p1 = scmp.eq.s32.totalorder %s6702_s30, 0  ;;  %p228_p2 = scmp.lt.s32.totalorder %s6616_s29, 3 }
   0xf   : > { %s6618_s9 = smov [#allocation8]   ;;  %s6619_s11 = smov [#allocation9]  }
  0x10   : > { %p6707_p3 = pnand %p4770_p0, %p228_p2  ;;  %s241_s10 = sshll.u32 %s6618_s9, 4  ;;  %s242_s10 = int_to_ptr.vmem [resolvable:$true] %s241_s10 }
  0x11   : > { %s251_s12 = sshll.u32 %s6619_s11, 4  ;;  %s6620_s14 = smov [#allocation12]   ;;  %s252_s12 = int_to_ptr.vmem [resolvable:$true] %s251_s12 }
  0x12   : > { %s7398_s8 = scalar_select %p6707_p3, 1, 0 }
  0x13   : > { %p5429_p4 = pneg %p6707_p3  ;;  %s275_s15 = sshll.u32 %s6620_s14, 4  ;;  %s276_s15 = int_to_ptr.vmem [resolvable:$true] %s275_s15 }
  0x14   : > { %s6347_s17 = scalar_lea.vmem %s242_s10, 64  ;;  %p6355_p10 = scmp.lt.s32.totalorder %s242_s10, %s242_s10 }
  0x15   : > { %p6715_p5 = pnand %p5429_p4, %p7391_p1  ;;  %p6348_p7 = scmp.ne.s32.totalorder %s242_s10, %s6347_s17 }
  0x16   : > { %p6356_p11 = scmp.lt.s32.totalorder %s6347_s17, %s6347_s17 }
  0x17   : > { %p6721_p6 = pneg %p6715_p5 }
  0x18   : > { %p6357_p12 = por %p6356_p11, %p6355_p10 }
  0x19   : > { %p6350_p8 = pnand %p6348_p7, %p6721_p6 }
  0x1b   : > { %p6351_p9 = pneg %p6350_p8 }
  0x1d   : > { %p6358_p13 = pnand %p6357_p12, %p6351_p9 }
  0x1f   : > { %6361 = shalt.err (!%p6358_p13)
}
  0x20   : > { %s7401_s2 = sld [smem:[#allocation23_spill]]  ;;  %s6373_s20 = scalar_lea.vmem %s252_s12, 16384 }
  0x21   : > { %p6374_p0 = scmp.ne.s32.totalorder %s252_s12, %s6373_s20  ;;  %p6381_p1 = scmp.lt.s32.totalorder %s252_s12, %s252_s12 }
  0x22   : > { %p6382_p7 = scmp.lt.s32.totalorder %s6373_s20, %s6373_s20 }
  0x23   : > { %p6376_p2 = pnand %p6374_p0, %p6721_p6 }
  0x24   : > { %p6383_p8 = por %p6382_p7, %p6381_p1 }
  0x25   : > { %p6377_p4 = pneg %p6376_p2 }
  0x26   : > { %5432 = dma.hbm_to_vmem [thread:$0]  (!%p6715_p5), %s7401_s2, 64, %s242_s10, [#allocation7]  }
  0x27   : > { %p6384_p3 = pnand %p6383_p8, %p6377_p4 }
  0x29   : > { %6387 = shalt.err (!%p6384_p3)
}
  0x2a   : > { %s7393_s21 = smov 256   ;;  %s7394_s22 = smov 16  }
  0x2b   : > { %s7402_s3 = sld [smem:[#allocation24_spill]]  ;;  %s6399_s10 = scalar_lea.vmem %s276_s15, 4096 }
  0x2c   : > { %p6400_p9 = scmp.ne.s32.totalorder %s276_s15, %s6399_s10  ;;  %p6407_p11 = scmp.lt.s32.totalorder %s276_s15, %s276_s15 }
  0x2d   : > { %p6408_p3 = scmp.lt.s32.totalorder %s6399_s10, %s6399_s10 }
  0x2e   : > { %p6402_p10 = pnand %p6400_p9, %p6721_p6 }
  0x2f   : > { %p6409_p12 = por %p6408_p3, %p6407_p11 }
  0x30   : > { %p6403_p1 = pneg %p6402_p10 }
  0x31   : > { %5435 = dma.hbm_to_vmem [thread:$0]  (!%p6715_p5), %s7402_s3, 16384, %s252_s12, [#allocation10], %s7393_s21, %s7393_s21, %s7394_s22  }
  0x32   : > { %p6410_p13 = pnand %p6409_p12, %p6403_p1 }
  0x34   : > { %6413 = shalt.err (!%p6410_p13)
}
  0x35   : > { %s6623_s11 = smov 64   ;;  %s6624_s14 = smov 4  }
  0x36   : > { %5441 = dma.hbm_to_vmem [thread:$0]  (!%p6715_p5), %s7388_s5, 4096, %s276_s15, [#allocation13], %s6623_s11, %s6623_s11, %s6624_s14  }
  0x37   : > { %s6625_s12 = smov [#allocation11]   ;;  %s6626_s20 = smov [#allocation14]  }
  0x38   : > { %s265_s19 = sshll.u32 %s6625_s12, 4  ;;  %s289_s23 = sshll.u32 %s6626_s20, 4  ;;  %s266_s19 = int_to_ptr.vmem [resolvable:$true] %s265_s19  ;;  %s290_s23 = int_to_ptr.vmem [resolvable:$true] %s289_s23 }
  0x39   : > { %s6425_s9 = scalar_lea.vmem %s266_s19, 64  ;;  %p6433_p7 = scmp.lt.s32.totalorder %s266_s19, %s266_s19 }
  0x3a   : > { %p6426_p0 = scmp.ne.s32.totalorder %s266_s19, %s6425_s9  ;;  %p6434_p8 = scmp.lt.s32.totalorder %s6425_s9, %s6425_s9 }
  0x3c   : > { %p6428_p2 = pnand %p6426_p0, %p6721_p6  ;;  %p6435_p9 = por %p6434_p8, %p6433_p7 }
  0x3e   : > { %p6429_p4 = pneg %p6428_p2 }
  0x40   : > { %p6436_p10 = pnand %p6435_p9, %p6429_p4 }
  0x42   : > { %6439 = shalt.err (!%p6436_p10)
}
  0x43   : > { %5438 = dma.hbm_to_vmem [thread:$0]  (!%p6715_p5), %s7387_s4, 64, %s266_s19, [#allocation10]  }
  0x44   : > { %s6451_s15 = scalar_lea.vmem %s290_s23, 16  ;;  %s6458_s11 = scalar_lea.vmem %s290_s23, 32 }
  0x45   : > { %p6452_p1 = scmp.ne.s32.totalorder %s290_s23, %s6451_s15  ;;  %p6459_p12 = scmp.lt.s32.totalorder %s290_s23, %s290_s23 }
  0x46   : > { %p6460_p13 = scmp.lt.s32.totalorder %s6458_s11, %s6451_s15 }
  0x47   : > { %p6454_p11 = pnand %p6452_p1, %p6721_p6 }
  0x48   : > { %p6461_p0 = por %p6460_p13, %p6459_p12 }
  0x49   : > { %p6455_p3 = pneg %p6454_p11 }
  0x4b   : > { %p6462_p2 = pnand %p6461_p0, %p6455_p3 }
  0x4d   : > { %6465 = shalt.err (!%p6462_p2)
}
  0x4e   : > { %5444 = dma.hbm_to_vmem [thread:$0]  (!%p6715_p5), %s7389_s6, 16, %s290_s23, [#allocation13]  }
  0x4f   : > { %s35_s16 = sadd.s32 1, %s6612_s28  ;;  %s47_s13 = sadd.s32 1, %s6604_s26 }
  0x50   : > { %p36_p6 = scmp.ge.s32.totalorder %s35_s16, 2  ;;  %p54_p4 = scmp.ne.s32.totalorder %s6604_s26, %s6600_s25 }
  0x51   : > { %p55_p7 = scmp.eq.s32.totalorder %s6616_s29, 0  ;;  %p60_p9 = scmp.ne.s32.totalorder %s6600_s25, %s6596_s24 }
  0x52   : > { %s7422_s16 = smov (%p36_p6, %s35_s16), 0  ;;  %p5457_p10 = scmp.lt.s32.totalorder %s6616_s29, 2 }
  0x53   : > { %p56_p8 = por %p55_p7, %p54_p4  ;;  %s43_s12 = ssub.s32 %s6612_s28, %s7422_s16 }
  0x54   : > { %p45_p1 = scmp.eq.s32.totalorder %s43_s12, 0  ;;  %p7403_p11 = scmp.eq.s32.totalorder %s6702_s30, 0 }
  0x55   : > { %s300_s20 = sand.u32 1, %s6604_s26   ;;  %s5349_s23 = smul.u32 768, %s6612_s28 }
  0x56   : > { %p6777_p3 = por %p7403_p11, %p60_p9  ;;  %s5397_s10 = smul.u32 48, %s300_s20 }
  0x57   : > { %s6784_s9 = scalar_select %p45_p1, %s6604_s26, %s47_s13  }
  0x58   : > { %s7405_s0 = sld [smem:[#allocation22_spill]]  ;;  %p6789_p5 = pnand %p5457_p10, %p56_p8 }
  0x59   : > { %s5398_s24 = smul.u32 3072, %s300_s20  ;;  %s304_s18 = scalar_lea.vmem [#allocation3], %s5397_s10 }
  0x5a   : > { %s314_s12 = sshll.u32 %s304_s18, 4  ;;  %s301_s21 = scalar_lea.sflag [#allocation4], %s300_s20  ;;  %s315_s12 = int_to_ptr.vmem [resolvable:$true] %s314_s12 }
  0x5b   : > { %p6468_p12 = pneg %p6789_p5  ;;  %s6479_s13 = scalar_lea.vmem %s315_s12, 768 }
  0x5c   : > { %p6480_p13 = scmp.ne.s32.totalorder %s315_s12, %s6479_s13 }
  0x5e   : > { %s312_s11 = scalar_lea.hbm %s7405_s0, %s5349_s23  ;;  %p6482_p0 = pnand %p6480_p13, %p6468_p12 }
  0x5f   : > { %s6627_s23 = smov [#allocation3]  }
  0x60   : > { %p6483_p2 = pneg %p6482_p0  ;;  %s6484_s17 = sshll.u32 %s6627_s23, 4  ;;  %s6485_s17 = int_to_ptr.vmem [resolvable:$false] %s6484_s17 }
  0x61   : > { %s6486_s15 = scalar_lea.vmem %s6485_s17, 1536  ;;  %p6487_p6 = scmp.lt.s32.totalorder %s315_s12, %s6485_s17 }
  0x62   : > { %p6488_p4 = scmp.lt.s32.totalorder %s6486_s15, %s6479_s13 }
  0x64   : > { %p6489_p7 = por %p6488_p4, %p6487_p6 }
  0x66   : > { %p6490_p8 = pnand %p6489_p7, %p6483_p2 }
  0x68   : > { %6493 = shalt.err (!%p6490_p8)
}
  0x69   : > { %5448 = dma.hbm_to_vmem [thread:$0]  (!%p6789_p5), %s312_s11, 768, %s315_s12, %s301_s21  }
  0x6a   : > { %s5352_s20 = smul.u32 49152, %s6612_s28  ;;  %s325_s10 = scalar_lea.vmem [#allocation6], %s5398_s24 }
  0x6b   : > { %s333_s18 = sshll.u32 %s325_s10, 4  ;;  %s321_s22 = sand.u32 1, %s6616_s29   ;;  %s334_s18 = int_to_ptr.vmem [resolvable:$true] %s333_s18 }
  0x6c   : > { %s332_s2 = scalar_lea.hbm %s7384_s1, %s5352_s20  ;;  %s322_s17 = scalar_lea.sflag [#allocation7], %s321_s22 }
  0x6d   : > { %s6507_s13 = scalar_lea.vmem %s334_s18, 49152  ;;  %s6628_s15 = smov [#allocation6]  }
  0x6e   : > { %p6508_p9 = scmp.ne.s32.totalorder %s334_s18, %s6507_s13  ;;  %s6512_s3 = sshll.u32 %s6628_s15, 4  ;;  %s6513_s3 = int_to_ptr.vmem [resolvable:$false] %s6512_s3 }
  0x6f   : > { %s6514_s21 = scalar_lea.vmem %s6513_s3, 98304  ;;  %p6515_p11 = scmp.lt.s32.totalorder %s334_s18, %s6513_s3 }
  0x70   : > { %p6510_p10 = pnand %p6508_p9, %p6468_p12  ;;  %p6516_p13 = scmp.lt.s32.totalorder %s6514_s21, %s6507_s13 }
  0x72   : > { %p6511_p1 = pneg %p6510_p10  ;;  %p6517_p0 = por %p6516_p13, %p6515_p11 }
  0x74   : > { %p6518_p2 = pnand %p6517_p0, %p6511_p1 }
  0x76   : > { %6521 = shalt.err (!%p6518_p2)
}
  0x77   : > { %s7407_s0 = smov 16   ;;  %s7408_s11 = smov 256  }
  0x78   : > { %5451 = dma.hbm_to_vmem [thread:$0]  (!%p6789_p5), %s332_s2, 49152, %s334_s18, %s322_s17, %s7408_s11, %s7408_s11, %s7407_s0  }
  0x79   : > { %p7409_p6 = scmp.ne.s32.totalorder %s7398_s8, 0 }
  0x7a   : > { %s347_s22 = sand.u32 (!%p7409_p6), 1, %s6600_s25  }
  0x7b   : > { %345 = sbr.rel (%p7409_p6) target bundleno = 1287 (0x507), region = 48  ;;  %s348_s12 = scalar_lea.sflag (!%p7409_p6), [#allocation4], %s347_s22 }
  0x7c   : > { %s5399_s24 = smul.u32 (!%p7409_p6), 48, %s347_s22 }
  0x7e   : > { %s6816_s20 = scalar_lea.vmem (!%p7409_p6), [#allocation3], %s5399_s24 }
  0x80   : > { %6571 = dma.done.wait (%p6777_p3), %s348_s12, 768  }
  0x81   : > { %6573 = vsyncadd (%p6777_p3), %s348_s12, 4294966528  ;;  %s356_s3 = sand.u32 1, %s6702_s30   ;;  %s5400_s14 = smul.u32 3072, %s347_s22 }
  0x82   : > { %s357_s2 = scalar_lea.sflag [#allocation7], %s356_s3 }
  0x83   : > { %s6823_s10 = scalar_lea.vmem [#allocation6], %s5400_s14 }
  0x84   : > { %6575 = dma.done.wait (%p6777_p3), %s357_s2, 49152  }
  0x85   : > { %6577 = vsyncadd (%p6777_p3), %s357_s2, 4294918144  ;;  %p7410_p5 = scmp.eq.s32.totalorder %s6702_s30, 0 }
  0x87   : > { %6579 = dma.done.wait (%p7410_p5), [#allocation7], 64   ;;  %p7411_p12 = pmov %p7410_p5 }
  0x88   : > { %p7412_p4 = pmov %p7410_p5 }
  0x89   : > { %6581 = vsyncadd (%p7411_p12), [#allocation7], 4294967232 }
  0x8a   : > { %6583 = dma.done.wait (%p7412_p4), [#allocation10], 16448   ;;  %p7413_p7 = pmov %p7412_p4 }
  0x8b   : > { %p7414_p8 = pmov %p7412_p4 }
  0x8c   : > { %6585 = vsyncadd (%p7413_p7), [#allocation10], 4294950848 }
  0x8d   : > { %6587 = dma.done.wait (%p7414_p8), [#allocation13], 4112   ;;  %p7415_p9 = pmov %p7412_p4 }
  0x8e   : > { %p4786_p3 = scmp.ne.s32.totalorder %s6608_s27, 0 }
  0x8f   : > { %6589 = vsyncadd (%p7415_p9), [#allocation13], 4294963184 }
  0x90   : > { %417 = sbr.rel (%p4786_p3) target bundleno = 152 (0x98), region = 80 }
  0x95   : > { %v6629_v0 = vmov 0.0  }
  0x96   : > { %418 = vst [vmem:[#allocation2 + $0x10] sm:$0xff] %v6629_v0  ;;  %419 = vst [vmem:[#allocation2] sm:$0xff] %v6629_v0 }
  0x97   : > { %420 = vst [vmem:[#allocation2 + $0x18] sm:$0xff] %v6629_v0  ;;  %421 = vst [vmem:[#allocation2 + $0x8] sm:$0xff] %v6629_v0 }
  0x98 PF: > { %v5524_v1 = vld [vmem:[%s6823_s10 + $0xe4] ss:$16 sps:$4 sm:$0xff]   ;;  %v5528_v3 = vld [vmem:[%s6823_s10 + $0xe0] ss:$16 sps:$4 sm:$0xff]   ;;  %v427_v49 = vld [vmem:[%s6816_s20 + $0x8] sm:$0xff]  ;;  %p5183_p10 = scmp.ne.s32.totalorder %s6608_s27, 1 }
  0x99   : > { %v5526_v2 = vld [vmem:[%s6823_s10 + $0x2e4] ss:$16 sps:$4 sm:$0xff]   ;;  %2778 = vmatprep.subr.bf16.mxu0 %v5524_v1  ;;  %v5529_v4 = vld [vmem:[%s6823_s10 + $0x2e0] ss:$16 sps:$4 sm:$0xff]   ;;  %v6894_v52 = vcombine.high %v427_v49, %v427_v49 }
  0x9a   : > { %2819 = vmatprep.subr.bf16.mxu1 %v5526_v2  ;;  %v5530_v5 = vld [vmem:[%s6823_s10 + $0xc4] ss:$16 sps:$4 sm:$0xff]   ;;  %2779 = vmatpush1.bf16.msra.mxu0 %v5528_v3  ;;  %v5534_v7 = vld [vmem:[%s6823_s10 + $0xc0] ss:$16 sps:$4 sm:$0xff]  }
  0x9b   : > { %2820 = vmatpush1.bf16.msra.mxu1 %v5529_v4  ;;  %v5532_v6 = vld [vmem:[%s6823_s10 + $0x2c4] ss:$16 sps:$4 sm:$0xff]   ;;  %2780 = vmatprep.subr.bf16.mxu0 %v5530_v5  ;;  %v5535_v8 = vld [vmem:[%s6823_s10 + $0x2c0] ss:$16 sps:$4 sm:$0xff]  }
  0x9c   : > { %2821 = vmatprep.subr.bf16.mxu1 %v5532_v6  ;;  %v5536_v9 = vld [vmem:[%s6823_s10 + $0xa4] ss:$16 sps:$4 sm:$0xff]   ;;  %v5540_v11 = vld [vmem:[%s6823_s10 + $0xa0] ss:$16 sps:$4 sm:$0xff]   ;;  %2851 = vmatprep.mubr.bf16.mxu1 %v6894_v52 }
  0x9d   : > { %v5538_v10 = vld [vmem:[%s6823_s10 + $0x2a4] ss:$16 sps:$4 sm:$0xff]   ;;  %v5541_v12 = vld [vmem:[%s6823_s10 + $0x2a0] ss:$16 sps:$4 sm:$0xff]  }
  0x9e   : > { %2781 = vmatpush1.bf16.msra.mxu0 %v5534_v7  ;;  %v5542_v13 = vld [vmem:[%s6823_s10 + $0x84] ss:$16 sps:$4 sm:$0xff]   ;;  %v5546_v15 = vld [vmem:[%s6823_s10 + $0x80] ss:$16 sps:$4 sm:$0xff]  }
  0x9f   : > { %2822 = vmatpush1.bf16.msra.mxu1 %v5535_v8  ;;  %2782 = vmatprep.subr.bf16.mxu0 %v5536_v9  ;;  %v5544_v14 = vld [vmem:[%s6823_s10 + $0x284] ss:$16 sps:$4 sm:$0xff]   ;;  %v5547_v16 = vld [vmem:[%s6823_s10 + $0x280] ss:$16 sps:$4 sm:$0xff]   ;;  %v6918_v8 = vcombine.low %v427_v49, %v427_v49 }
  0xa0   : > { %2823 = vmatprep.subr.bf16.mxu1 %v5538_v10  ;;  %v5548_v17 = vld [vmem:[%s6823_s10 + $0x64] ss:$16 sps:$4 sm:$0xff]   ;;  %v5552_v19 = vld [vmem:[%s6823_s10 + $0x60] ss:$16 sps:$4 sm:$0xff]  }
  0xa1   : > { %v5550_v18 = vld [vmem:[%s6823_s10 + $0x264] ss:$16 sps:$4 sm:$0xff]   ;;  %v5553_v20 = vld [vmem:[%s6823_s10 + $0x260] ss:$16 sps:$4 sm:$0xff]  }
  0xa2   : > { %2783 = vmatpush1.bf16.msra.mxu0 %v5540_v11  ;;  %v5554_v21 = vld [vmem:[%s6823_s10 + $0x44] ss:$16 sps:$4 sm:$0xff]   ;;  %v5558_v23 = vld [vmem:[%s6823_s10 + $0x40] ss:$16 sps:$4 sm:$0xff]  }
  0xa3   : > { %2824 = vmatpush1.bf16.msra.mxu1 %v5541_v12  ;;  %2784 = vmatprep.subr.bf16.mxu0 %v5542_v13  ;;  %v5556_v22 = vld [vmem:[%s6823_s10 + $0x244] ss:$16 sps:$4 sm:$0xff]   ;;  %v5559_v24 = vld [vmem:[%s6823_s10 + $0x240] ss:$16 sps:$4 sm:$0xff]  }
  0xa4   : > { %2825 = vmatprep.subr.bf16.mxu1 %v5544_v14  ;;  %v5560_v25 = vld [vmem:[%s6823_s10 + $0x24] ss:$16 sps:$4 sm:$0xff]   ;;  %v5564_v27 = vld [vmem:[%s6823_s10 + $0x20] ss:$16 sps:$4 sm:$0xff]  }
  0xa5   : > { %v5562_v26 = vld [vmem:[%s6823_s10 + $0x224] ss:$16 sps:$4 sm:$0xff]   ;;  %v5565_v28 = vld [vmem:[%s6823_s10 + $0x220] ss:$16 sps:$4 sm:$0xff]  }
  0xa6   : > { %2785 = vmatpush1.bf16.msra.mxu0 %v5546_v15  ;;  %v5566_v29 = vld [vmem:[%s6823_s10 + $0x4] ss:$16 sps:$4 sm:$0xff]   ;;  %v5570_v31 = vld [vmem:[%s6823_s10] ss:$16 sps:$4 sm:$0xff]  }
  0xa7   : > { %2826 = vmatpush1.bf16.msra.mxu1 %v5547_v16  ;;  %2786 = vmatprep.subr.bf16.mxu0 %v5548_v17  ;;  %v5568_v30 = vld [vmem:[%s6823_s10 + $0x204] ss:$16 sps:$4 sm:$0xff]   ;;  %v5571_v32 = vld [vmem:[%s6823_s10 + $0x200] ss:$16 sps:$4 sm:$0xff]  }
  0xa8   : > { %2827 = vmatprep.subr.bf16.mxu1 %v5550_v18  ;;  %v5572_v33 = vld [vmem:[%s6823_s10 + $0x1e4] ss:$16 sps:$4 sm:$0xff]   ;;  %v5576_v35 = vld [vmem:[%s6823_s10 + $0x1e0] ss:$16 sps:$4 sm:$0xff]  }
  0xa9   : > { %v5574_v34 = vld [vmem:[%s6823_s10 + $0x3e4] ss:$16 sps:$4 sm:$0xff]   ;;  %v5577_v36 = vld [vmem:[%s6823_s10 + $0x3e0] ss:$16 sps:$4 sm:$0xff]  }
  0xaa   : > { %2787 = vmatpush1.bf16.msra.mxu0 %v5552_v19  ;;  %v5578_v37 = vld [vmem:[%s6823_s10 + $0x1c4] ss:$16 sps:$4 sm:$0xff]   ;;  %v5582_v39 = vld [vmem:[%s6823_s10 + $0x1c0] ss:$16 sps:$4 sm:$0xff]  }
  0xab   : > { %2828 = vmatpush1.bf16.msra.mxu1 %v5553_v20  ;;  %2788 = vmatprep.subr.bf16.mxu0 %v5554_v21  ;;  %v5580_v38 = vld [vmem:[%s6823_s10 + $0x3c4] ss:$16 sps:$4 sm:$0xff]   ;;  %v5583_v40 = vld [vmem:[%s6823_s10 + $0x3c0] ss:$16 sps:$4 sm:$0xff]  }
  0xac   : > { %2829 = vmatprep.subr.bf16.mxu1 %v5556_v22  ;;  %v5584_v41 = vld [vmem:[%s6823_s10 + $0x1a4] ss:$16 sps:$4 sm:$0xff]   ;;  %v5588_v43 = vld [vmem:[%s6823_s10 + $0x1a0] ss:$16 sps:$4 sm:$0xff]  }
  0xad   : > { %v5586_v42 = vld [vmem:[%s6823_s10 + $0x3a4] ss:$16 sps:$4 sm:$0xff]   ;;  %v5589_v44 = vld [vmem:[%s6823_s10 + $0x3a0] ss:$16 sps:$4 sm:$0xff]  }
  0xae   : > { %2789 = vmatpush1.bf16.msra.mxu0 %v5558_v23  ;;  %v5590_v45 = vld [vmem:[%s6823_s10 + $0x184] ss:$16 sps:$4 sm:$0xff]   ;;  %v5594_v50 = vld [vmem:[%s6823_s10 + $0x180] ss:$16 sps:$4 sm:$0xff]  }
  0xaf   : > { %2830 = vmatpush1.bf16.msra.mxu1 %v5559_v24  ;;  %2790 = vmatprep.subr.bf16.mxu0 %v5560_v25  ;;  %v5592_v46 = vld [vmem:[%s6823_s10 + $0x384] ss:$16 sps:$4 sm:$0xff]   ;;  %v5595_v51 = vld [vmem:[%s6823_s10 + $0x380] ss:$16 sps:$4 sm:$0xff]  }
  0xb0   : > { %2831 = vmatprep.subr.bf16.mxu1 %v5562_v26  ;;  %v426_v47 = vld [vmem:[%s6816_s20] sm:$0xff] }
  0xb1   : > { %v6889_v48 = vcombine.high %v426_v47, %v426_v47  ;;  %v5596_v53 = vld [vmem:[%s6823_s10 + $0x164] ss:$16 sps:$4 sm:$0xff]   ;;  %v5600_v55 = vld [vmem:[%s6823_s10 + $0x160] ss:$16 sps:$4 sm:$0xff]   ;;  %v6916_v7 = vcombine.low %v426_v47, %v426_v47 }
  0xb2   : > { %2791 = vmatpush1.bf16.msra.mxu0 %v5564_v27  ;;  %v5598_v54 = vld [vmem:[%s6823_s10 + $0x364] ss:$16 sps:$4 sm:$0xff]   ;;  %v5601_v56 = vld [vmem:[%s6823_s10 + $0x360] ss:$16 sps:$4 sm:$0xff]  }
  0xb3   : > { %2832 = vmatpush1.bf16.msra.mxu1 %v5565_v28  ;;  %2792 = vmatprep.subr.bf16.mxu0 %v5566_v29  ;;  %v5602_v57 = vld [vmem:[%s6823_s10 + $0x144] ss:$16 sps:$4 sm:$0xff]   ;;  %v5606_v59 = vld [vmem:[%s6823_s10 + $0x140] ss:$16 sps:$4 sm:$0xff]  }
  0xb4   : > { %2833 = vmatprep.subr.bf16.mxu1 %v5568_v30  ;;  %2810 = vmatprep.mubr.bf16.mxu0 %v6889_v48  ;;  %v5604_v58 = vld [vmem:[%s6823_s10 + $0x344] ss:$16 sps:$4 sm:$0xff]   ;;  %v5607_v60 = vld [vmem:[%s6823_s10 + $0x340] ss:$16 sps:$4 sm:$0xff]  }
  0xb5   : > { %v5608_v61 = vld [vmem:[%s6823_s10 + $0x124] ss:$16 sps:$4 sm:$0xff]   ;;  %v5612_v63 = vld [vmem:[%s6823_s10 + $0x120] ss:$16 sps:$4 sm:$0xff]  }
  0xb6   : > { %2793 = vmatpush1.bf16.msra.mxu0 %v5570_v31  ;;  %v5610_v62 = vld [vmem:[%s6823_s10 + $0x324] ss:$16 sps:$4 sm:$0xff]   ;;  %v5613_v0 = vld [vmem:[%s6823_s10 + $0x320] ss:$16 sps:$4 sm:$0xff]  }
  0xb7   : > { %2834 = vmatpush1.bf16.msra.mxu1 %v5571_v32  ;;  %2794 = vmatprep.subr.bf16.mxu0 %v5572_v33  ;;  %v5614_v1 = vld [vmem:[%s6823_s10 + $0x104] ss:$16 sps:$4 sm:$0xff]   ;;  %v5618_v3 = vld [vmem:[%s6823_s10 + $0x100] ss:$16 sps:$4 sm:$0xff]  }
  0xb8   : > { %2835 = vmatprep.subr.bf16.mxu1 %v5574_v34  ;;  %v5616_v2 = vld [vmem:[%s6823_s10 + $0x304] ss:$16 sps:$4 sm:$0xff]   ;;  %v5619_v4 = vld [vmem:[%s6823_s10 + $0x300] ss:$16 sps:$4 sm:$0xff]   ;;  %v6950_v34 = vld [vmem:[%s6816_s20 + $0x18] sm:$0xff] }
  0xb9   : > { %v5626_v5 = vld [vmem:[%s6823_s10 + $0x4e4] ss:$16 sps:$4 sm:$0xff]   ;;  %v5624_v9 = vld [vmem:[%s6823_s10 + $0x4e0] ss:$16 sps:$4 sm:$0xff]  }
  0xba   : > { %2795 = vmatpush2.bf16.msra.mxu0 %v5576_v35  ;;  %v5629_v6 = vld [vmem:[%s6823_s10 + $0x6e4] ss:$16 sps:$4 sm:$0xff]   ;;  %v5627_v10 = vld [vmem:[%s6823_s10 + $0x6e0] ss:$16 sps:$4 sm:$0xff]  }
  0xbb   : > { %2836 = vmatpush2.bf16.msra.mxu1 %v5577_v36  ;;  %2796 = vmatprep.subr.bf16.mxu0 %v5578_v37  ;;  %v5632_v11 = vld [vmem:[%s6823_s10 + $0x4c4] ss:$16 sps:$4 sm:$0xff]   ;;  %v5630_v13 = vld [vmem:[%s6823_s10 + $0x4c0] ss:$16 sps:$4 sm:$0xff]  }
  0xbc   : > { %2837 = vmatprep.subr.bf16.mxu1 %v5580_v38  ;;  %v5635_v12 = vld [vmem:[%s6823_s10 + $0x6c4] ss:$16 sps:$4 sm:$0xff]   ;;  %v5633_v14 = vld [vmem:[%s6823_s10 + $0x6c0] ss:$16 sps:$4 sm:$0xff]   ;;  %v6960_v38 = vcombine.high %v6950_v34, %v6950_v34 }
  0xbd   : > { %v5638_v15 = vld [vmem:[%s6823_s10 + $0x4a4] ss:$16 sps:$4 sm:$0xff]   ;;  %v5636_v17 = vld [vmem:[%s6823_s10 + $0x4a0] ss:$16 sps:$4 sm:$0xff]  }
  0xbe   : > { %2797 = vmatpush2.bf16.msra.mxu0 %v5582_v39  ;;  %v5641_v16 = vld [vmem:[%s6823_s10 + $0x6a4] ss:$16 sps:$4 sm:$0xff]   ;;  %v5639_v18 = vld [vmem:[%s6823_s10 + $0x6a0] ss:$16 sps:$4 sm:$0xff]  }
  0xbf   : > { %2838 = vmatpush2.bf16.msra.mxu1 %v5583_v40  ;;  %2798 = vmatprep.subr.bf16.mxu0 %v5584_v41  ;;  %v5644_v19 = vld [vmem:[%s6823_s10 + $0x484] ss:$16 sps:$4 sm:$0xff]   ;;  %v5642_v21 = vld [vmem:[%s6823_s10 + $0x480] ss:$16 sps:$4 sm:$0xff]  }
  0xc0   : > { %2839 = vmatprep.subr.bf16.mxu1 %v5586_v42  ;;  %v5647_v20 = vld [vmem:[%s6823_s10 + $0x684] ss:$16 sps:$4 sm:$0xff]   ;;  %v5645_v22 = vld [vmem:[%s6823_s10 + $0x680] ss:$16 sps:$4 sm:$0xff]  }
  0xc1   : > { %v5650_v23 = vld [vmem:[%s6823_s10 + $0x464] ss:$16 sps:$4 sm:$0xff]   ;;  %v5648_v25 = vld [vmem:[%s6823_s10 + $0x460] ss:$16 sps:$4 sm:$0xff]  }
  0xc2   : > { %2799 = vmatpush2.bf16.msra.mxu0 %v5588_v43  ;;  %v5653_v24 = vld [vmem:[%s6823_s10 + $0x664] ss:$16 sps:$4 sm:$0xff]   ;;  %v5651_v26 = vld [vmem:[%s6823_s10 + $0x660] ss:$16 sps:$4 sm:$0xff]  }
  0xc3   : > { %2840 = vmatpush2.bf16.msra.mxu1 %v5589_v44  ;;  %2800 = vmatprep.subr.bf16.mxu0 %v5590_v45  ;;  %v5656_v27 = vld [vmem:[%s6823_s10 + $0x444] ss:$16 sps:$4 sm:$0xff]   ;;  %v5654_v29 = vld [vmem:[%s6823_s10 + $0x440] ss:$16 sps:$4 sm:$0xff]  }
  0xc4   : > { %2841 = vmatprep.subr.bf16.mxu1 %v5592_v46  ;;  %v5659_v28 = vld [vmem:[%s6823_s10 + $0x644] ss:$16 sps:$4 sm:$0xff]   ;;  %v5657_v30 = vld [vmem:[%s6823_s10 + $0x640] ss:$16 sps:$4 sm:$0xff]  }
  0xc5   : > { %v5662_v31 = vld [vmem:[%s6823_s10 + $0x424] ss:$16 sps:$4 sm:$0xff]   ;;  %v5660_v35 = vld [vmem:[%s6823_s10 + $0x420] ss:$16 sps:$4 sm:$0xff]  }
  0xc6   : > { %2801 = vmatpush2.bf16.msra.mxu0 %v5594_v50  ;;  %v5665_v32 = vld [vmem:[%s6823_s10 + $0x624] ss:$16 sps:$4 sm:$0xff]   ;;  %v5663_v36 = vld [vmem:[%s6823_s10 + $0x620] ss:$16 sps:$4 sm:$0xff]  }
  0xc7   : > { %2842 = vmatpush2.bf16.msra.mxu1 %v5595_v51  ;;  %2802 = vmatprep.subr.bf16.mxu0 %v5596_v53  ;;  %v6947_v33 = vld [vmem:[%s6816_s20 + $0x10] sm:$0xff] }
  0xc8   : > { %2843 = vmatprep.subr.bf16.mxu1 %v5598_v54  ;;  %v6956_v37 = vcombine.high %v6947_v33, %v6947_v33  ;;  %v5668_v39 = vld [vmem:[%s6823_s10 + $0x404] ss:$16 sps:$4 sm:$0xff]   ;;  %v5666_v41 = vld [vmem:[%s6823_s10 + $0x400] ss:$16 sps:$4 sm:$0xff]  }
  0xc9   : > { %v5671_v40 = vld [vmem:[%s6823_s10 + $0x604] ss:$16 sps:$4 sm:$0xff]   ;;  %v5669_v42 = vld [vmem:[%s6823_s10 + $0x600] ss:$16 sps:$4 sm:$0xff]  }
  0xca   : > { %2803 = vmatpush2.bf16.msra.mxu0 %v5600_v55  ;;  %v5674_v43 = vld [vmem:[%s6823_s10 + $0x5e4] ss:$16 sps:$4 sm:$0xff]   ;;  %v5672_v45 = vld [vmem:[%s6823_s10 + $0x5e0] ss:$16 sps:$4 sm:$0xff]  }
  0xcb   : > { %2844 = vmatpush2.bf16.msra.mxu1 %v5601_v56  ;;  %2804 = vmatprep.subr.bf16.mxu0 %v5602_v57  ;;  %v5677_v44 = vld [vmem:[%s6823_s10 + $0x7e4] ss:$16 sps:$4 sm:$0xff]   ;;  %v5675_v46 = vld [vmem:[%s6823_s10 + $0x7e0] ss:$16 sps:$4 sm:$0xff]  }
  0xcc   : > { %2845 = vmatprep.subr.bf16.mxu1 %v5604_v58  ;;  %v5680_v47 = vld [vmem:[%s6823_s10 + $0x5c4] ss:$16 sps:$4 sm:$0xff]   ;;  %v5678_v50 = vld [vmem:[%s6823_s10 + $0x5c0] ss:$16 sps:$4 sm:$0xff]  }
  0xcd   : > { %v5683_v49 = vld [vmem:[%s6823_s10 + $0x7c4] ss:$16 sps:$4 sm:$0xff]   ;;  %v5681_v51 = vld [vmem:[%s6823_s10 + $0x7c0] ss:$16 sps:$4 sm:$0xff]  }
  0xce   : > { %2805 = vmatpush2.bf16.msra.mxu0 %v5606_v59  ;;  %v5686_v53 = vld [vmem:[%s6823_s10 + $0x5a4] ss:$16 sps:$4 sm:$0xff]   ;;  %v5684_v55 = vld [vmem:[%s6823_s10 + $0x5a0] ss:$16 sps:$4 sm:$0xff]  }
  0xcf   : > { %2846 = vmatpush2.bf16.msra.mxu1 %v5607_v60  ;;  %2806 = vmatprep.subr.bf16.mxu0 %v5608_v61  ;;  %v5689_v54 = vld [vmem:[%s6823_s10 + $0x7a4] ss:$16 sps:$4 sm:$0xff]   ;;  %v5687_v56 = vld [vmem:[%s6823_s10 + $0x7a0] ss:$16 sps:$4 sm:$0xff]  }
  0xd0   : > { %2847 = vmatprep.subr.bf16.mxu1 %v5610_v62  ;;  %v5692_v57 = vld [vmem:[%s6823_s10 + $0x584] ss:$16 sps:$4 sm:$0xff]   ;;  %v5690_v59 = vld [vmem:[%s6823_s10 + $0x580] ss:$16 sps:$4 sm:$0xff]  }
  0xd1   : > { %v5695_v58 = vld [vmem:[%s6823_s10 + $0x784] ss:$16 sps:$4 sm:$0xff]   ;;  %v5693_v60 = vld [vmem:[%s6823_s10 + $0x780] ss:$16 sps:$4 sm:$0xff]  }
  0xd2   : > { %2807 = vmatpush2.bf16.msra.mxu0 %v5612_v63  ;;  %v5698_v61 = vld [vmem:[%s6823_s10 + $0x564] ss:$16 sps:$4 sm:$0xff]   ;;  %v5696_v63 = vld [vmem:[%s6823_s10 + $0x560] ss:$16 sps:$4 sm:$0xff]  }
  0xd3   : > { %2848 = vmatpush2.bf16.msra.mxu1 %v5613_v0  ;;  %2808 = vmatprep.subr.bf16.mxu0 %v5614_v1  ;;  %v5701_v62 = vld [vmem:[%s6823_s10 + $0x764] ss:$16 sps:$4 sm:$0xff]   ;;  %v5699_v0 = vld [vmem:[%s6823_s10 + $0x760] ss:$16 sps:$4 sm:$0xff]  }
  0xd4   : > { %2849 = vmatprep.subr.bf16.mxu1 %v5616_v2  ;;  %v5704_v1 = vld [vmem:[%s6823_s10 + $0x544] ss:$16 sps:$4 sm:$0xff]  }
  0xd5   : > { %v5707_v2 = vld [vmem:[%s6823_s10 + $0x744] ss:$16 sps:$4 sm:$0xff]  }
  0xd6   : > { %2809 = vmatpush2.bf16.msra.mxu0 %v5618_v3  ;;  %v5702_v3 = vld [vmem:[%s6823_s10 + $0x540] ss:$16 sps:$4 sm:$0xff]  }
  0xd7   : > { %2850 = vmatpush2.bf16.msra.mxu1 %v5619_v4  ;;  %2860 = vmatprep.subr.bf16.mxu0 %v5626_v5  ;;  %v5705_v4 = vld [vmem:[%s6823_s10 + $0x740] ss:$16 sps:$4 sm:$0xff]   ;;  %v5710_v5 = vld [vmem:[%s6823_s10 + $0x524] ss:$16 sps:$4 sm:$0xff]  }
  0xd8   : > { %2901 = vmatprep.subr.bf16.mxu1 %v5629_v6  ;;  %v5713_v6 = vld [vmem:[%s6823_s10 + $0x724] ss:$16 sps:$4 sm:$0xff]  }
  0xd9   : > { %2811 = vmatmul.mubr.bf16.vlgmr.msra.gmra.mxu0 %v6916_v7 }
  0xda   : > { %2852 = vmatmul.mubr.bf16.vlgmr.msra.gmra.mxu1 %v6918_v8  ;;  %2861 = vmatpush1.bf16.msra.mxu0 %v5624_v9  ;;  %v5708_v9 = vld [vmem:[%s6823_s10 + $0x520] ss:$16 sps:$4 sm:$0xff]  }
  0xdb   : > { %2902 = vmatpush1.bf16.msra.mxu1 %v5627_v10  ;;  %2862 = vmatprep.subr.bf16.mxu0 %v5632_v11  ;;  %v5711_v10 = vld [vmem:[%s6823_s10 + $0x720] ss:$16 sps:$4 sm:$0xff]   ;;  %v5716_v11 = vld [vmem:[%s6823_s10 + $0x504] ss:$16 sps:$4 sm:$0xff]  }
  0xdc   : > { %2903 = vmatprep.subr.bf16.mxu1 %v5635_v12  ;;  %2892 = vmatprep.mubr.bf16.mxu0 %v6956_v37  ;;  %v5719_v12 = vld [vmem:[%s6823_s10 + $0x704] ss:$16 sps:$4 sm:$0xff]  }
  0xdd   : > { %2933 = vmatprep.mubr.bf16.mxu1 %v6960_v38 }
  0xde   : > { %2863 = vmatpush1.bf16.msra.mxu0 %v5630_v13  ;;  %v5714_v13 = vld [vmem:[%s6823_s10 + $0x500] ss:$16 sps:$4 sm:$0xff]  }
  0xdf   : > { %2904 = vmatpush1.bf16.msra.mxu1 %v5633_v14  ;;  %2864 = vmatprep.subr.bf16.mxu0 %v5638_v15  ;;  %v5717_v14 = vld [vmem:[%s6823_s10 + $0x700] ss:$16 sps:$4 sm:$0xff]   ;;  %v5726_v15 = vld [vmem:[%s6823_s10 + $0x8e4] ss:$16 sps:$4 sm:$0xff]  }
  0xe0   : > { %2905 = vmatprep.subr.bf16.mxu1 %v5641_v16  ;;  %v5729_v16 = vld [vmem:[%s6823_s10 + $0xae4] ss:$16 sps:$4 sm:$0xff]  }
  0xe2   : > { %2865 = vmatpush1.bf16.msra.mxu0 %v5636_v17  ;;  %v7004_v17 = vcombine.low %v6947_v33, %v6947_v33  ;;  %v5744_v33 = vld [vmem:[%s6823_s10 + $0x884] ss:$16 sps:$4 sm:$0xff]  }
  0xe3   : > { %2906 = vmatpush1.bf16.msra.mxu1 %v5639_v18  ;;  %2866 = vmatprep.subr.bf16.mxu0 %v5644_v19  ;;  %v7008_v18 = vcombine.low %v6950_v34, %v6950_v34  ;;  %v5724_v19 = vld [vmem:[%s6823_s10 + $0x8e0] ss:$16 sps:$4 sm:$0xff]   ;;  %v5747_v34 = vld [vmem:[%s6823_s10 + $0xa84] ss:$16 sps:$4 sm:$0xff]  }
  0xe4   : > { %2907 = vmatprep.subr.bf16.mxu1 %v5647_v20  ;;  %v5727_v20 = vld [vmem:[%s6823_s10 + $0xae0] ss:$16 sps:$4 sm:$0xff]  }
  0xe6   : > { %2867 = vmatpush1.bf16.msra.mxu0 %v5642_v21  ;;  %v5732_v21 = vld [vmem:[%s6823_s10 + $0x8c4] ss:$16 sps:$4 sm:$0xff]  }
  0xe7   : > { %2908 = vmatpush1.bf16.msra.mxu1 %v5645_v22  ;;  %2868 = vmatprep.subr.bf16.mxu0 %v5650_v23  ;;  %v5735_v22 = vld [vmem:[%s6823_s10 + $0xac4] ss:$16 sps:$4 sm:$0xff]  }
  0xe8   : > { %2909 = vmatprep.subr.bf16.mxu1 %v5653_v24  ;;  %v7015_v23 = vld [vmem:[%s6816_s20 + $0x20] sm:$0xff]  ;;  %v7018_v24 = vld [vmem:[%s6816_s20 + $0x28] sm:$0xff] }
  0xea   : > { %2869 = vmatpush1.bf16.msra.mxu0 %v5648_v25  ;;  %v7022_v25 = vcombine.high %v7015_v23, %v7015_v23 }
  0xeb   : > { %2910 = vmatpush1.bf16.msra.mxu1 %v5651_v26  ;;  %2870 = vmatprep.subr.bf16.mxu0 %v5656_v27  ;;  %v7026_v26 = vcombine.high %v7018_v24, %v7018_v24  ;;  %v5730_v27 = vld [vmem:[%s6823_s10 + $0x8c0] ss:$16 sps:$4 sm:$0xff]  }
  0xec   : > { %2911 = vmatprep.subr.bf16.mxu1 %v5659_v28  ;;  %v5733_v28 = vld [vmem:[%s6823_s10 + $0xac0] ss:$16 sps:$4 sm:$0xff]  }
  0xee   : > { %2871 = vmatpush1.bf16.msra.mxu0 %v5654_v29  ;;  %v5738_v29 = vld [vmem:[%s6823_s10 + $0x8a4] ss:$16 sps:$4 sm:$0xff]  }
  0xef   : > { %2912 = vmatpush1.bf16.msra.mxu1 %v5657_v30  ;;  %2872 = vmatprep.subr.bf16.mxu0 %v5662_v31  ;;  %v5741_v30 = vld [vmem:[%s6823_s10 + $0xaa4] ss:$16 sps:$4 sm:$0xff]   ;;  %v5736_v31 = vld [vmem:[%s6823_s10 + $0x8a0] ss:$16 sps:$4 sm:$0xff]  }
  0xf0   : > { %2913 = vmatprep.subr.bf16.mxu1 %v5665_v32  ;;  %v5739_v32 = vld [vmem:[%s6823_s10 + $0xaa0] ss:$16 sps:$4 sm:$0xff]  }
  0xf2   : > { %2873 = vmatpush1.bf16.msra.mxu0 %v5660_v35  ;;  %v5742_v35 = vld [vmem:[%s6823_s10 + $0x880] ss:$16 sps:$4 sm:$0xff]  }
  0xf3   : > { %2914 = vmatpush1.bf16.msra.mxu1 %v5663_v36  ;;  %2874 = vmatprep.subr.bf16.mxu0 %v5668_v39  ;;  %v5745_v36 = vld [vmem:[%s6823_s10 + $0xa80] ss:$16 sps:$4 sm:$0xff]   ;;  %v5750_v39 = vld [vmem:[%s6823_s10 + $0x864] ss:$16 sps:$4 sm:$0xff]  }
  0xf4   : > { %2915 = vmatprep.subr.bf16.mxu1 %v5671_v40  ;;  %v5753_v40 = vld [vmem:[%s6823_s10 + $0xa64] ss:$16 sps:$4 sm:$0xff]  }
  0xf6   : > { %2875 = vmatpush1.bf16.msra.mxu0 %v5666_v41  ;;  %v5748_v41 = vld [vmem:[%s6823_s10 + $0x860] ss:$16 sps:$4 sm:$0xff]  }
  0xf7   : > { %2916 = vmatpush1.bf16.msra.mxu1 %v5669_v42  ;;  %2876 = vmatprep.subr.bf16.mxu0 %v5674_v43  ;;  %v5751_v42 = vld [vmem:[%s6823_s10 + $0xa60] ss:$16 sps:$4 sm:$0xff]   ;;  %v5756_v43 = vld [vmem:[%s6823_s10 + $0x844] ss:$16 sps:$4 sm:$0xff]  }
  0xf8   : > { %2917 = vmatprep.subr.bf16.mxu1 %v5677_v44  ;;  %v5759_v44 = vld [vmem:[%s6823_s10 + $0xa44] ss:$16 sps:$4 sm:$0xff]  }
  0xfa   : > { %2877 = vmatpush2.bf16.msra.mxu0 %v5672_v45  ;;  %v5754_v45 = vld [vmem:[%s6823_s10 + $0x840] ss:$16 sps:$4 sm:$0xff]  }
  0xfb   : > { %2918 = vmatpush2.bf16.msra.mxu1 %v5675_v46  ;;  %2878 = vmatprep.subr.bf16.mxu0 %v5680_v47  ;;  %v5757_v46 = vld [vmem:[%s6823_s10 + $0xa40] ss:$16 sps:$4 sm:$0xff]   ;;  %v5762_v47 = vld [vmem:[%s6823_s10 + $0x824] ss:$16 sps:$4 sm:$0xff]  }
  0xfc   : > { %2919 = vmatprep.subr.bf16.mxu1 %v5683_v49  ;;  %v5765_v49 = vld [vmem:[%s6823_s10 + $0xa24] ss:$16 sps:$4 sm:$0xff]  }
  0xfe   : > { %2879 = vmatpush2.bf16.msra.mxu0 %v5678_v50  ;;  %v5760_v50 = vld [vmem:[%s6823_s10 + $0x820] ss:$16 sps:$4 sm:$0xff]  }
  0xff   : > { %2920 = vmatpush2.bf16.msra.mxu1 %v5681_v51  ;;  %2880 = vmatprep.subr.bf16.mxu0 %v5686_v53  ;;  %v5763_v51 = vld [vmem:[%s6823_s10 + $0xa20] ss:$16 sps:$4 sm:$0xff]   ;;  %v5768_v53 = vld [vmem:[%s6823_s10 + $0x804] ss:$16 sps:$4 sm:$0xff]  }
 0x100   : > { %2921 = vmatprep.subr.bf16.mxu1 %v5689_v54  ;;  %v5771_v54 = vld [vmem:[%s6823_s10 + $0xa04] ss:$16 sps:$4 sm:$0xff]  }
 0x102   : > { %2881 = vmatpush2.bf16.msra.mxu0 %v5684_v55  ;;  %v5766_v55 = vld [vmem:[%s6823_s10 + $0x800] ss:$16 sps:$4 sm:$0xff]  }
 0x103   : > { %2922 = vmatpush2.bf16.msra.mxu1 %v5687_v56  ;;  %2882 = vmatprep.subr.bf16.mxu0 %v5692_v57  ;;  %v5769_v56 = vld [vmem:[%s6823_s10 + $0xa00] ss:$16 sps:$4 sm:$0xff]   ;;  %v5774_v57 = vld [vmem:[%s6823_s10 + $0x9e4] ss:$16 sps:$4 sm:$0xff]  }
 0x104   : > { %2923 = vmatprep.subr.bf16.mxu1 %v5695_v58  ;;  %v5777_v58 = vld [vmem:[%s6823_s10 + $0xbe4] ss:$16 sps:$4 sm:$0xff]  }
 0x106   : > { %2883 = vmatpush2.bf16.msra.mxu0 %v5690_v59  ;;  %v5772_v59 = vld [vmem:[%s6823_s10 + $0x9e0] ss:$16 sps:$4 sm:$0xff]  }
 0x107   : > { %2924 = vmatpush2.bf16.msra.mxu1 %v5693_v60  ;;  %2884 = vmatprep.subr.bf16.mxu0 %v5698_v61  ;;  %v5775_v60 = vld [vmem:[%s6823_s10 + $0xbe0] ss:$16 sps:$4 sm:$0xff]   ;;  %v5780_v61 = vld [vmem:[%s6823_s10 + $0x9c4] ss:$16 sps:$4 sm:$0xff]  }
 0x108   : > { %2925 = vmatprep.subr.bf16.mxu1 %v5701_v62  ;;  %v5783_v62 = vld [vmem:[%s6823_s10 + $0xbc4] ss:$16 sps:$4 sm:$0xff]  }
 0x10a   : > { %2885 = vmatpush2.bf16.msra.mxu0 %v5696_v63  ;;  %v5778_v63 = vld [vmem:[%s6823_s10 + $0x9c0] ss:$16 sps:$4 sm:$0xff]  }
 0x10b   : > { %2926 = vmatpush2.bf16.msra.mxu1 %v5699_v0  ;;  %2886 = vmatprep.subr.bf16.mxu0 %v5704_v1  ;;  %v5781_v0 = vld [vmem:[%s6823_s10 + $0xbc0] ss:$16 sps:$4 sm:$0xff]   ;;  %v5786_v1 = vld [vmem:[%s6823_s10 + $0x9a4] ss:$16 sps:$4 sm:$0xff]  }
 0x10c   : > { %2927 = vmatprep.subr.bf16.mxu1 %v5707_v2  ;;  %v5789_v2 = vld [vmem:[%s6823_s10 + $0xba4] ss:$16 sps:$4 sm:$0xff]  }
 0x10e   : > { %2887 = vmatpush2.bf16.msra.mxu0 %v5702_v3  ;;  %v5784_v3 = vld [vmem:[%s6823_s10 + $0x9a0] ss:$16 sps:$4 sm:$0xff]  }
 0x10f   : > { %2928 = vmatpush2.bf16.msra.mxu1 %v5705_v4  ;;  %2888 = vmatprep.subr.bf16.mxu0 %v5710_v5  ;;  %v5787_v4 = vld [vmem:[%s6823_s10 + $0xba0] ss:$16 sps:$4 sm:$0xff]   ;;  %v5792_v5 = vld [vmem:[%s6823_s10 + $0x984] ss:$16 sps:$4 sm:$0xff]  }
 0x110   : > { %2929 = vmatprep.subr.bf16.mxu1 %v5713_v6  ;;  %v5795_v6 = vld [vmem:[%s6823_s10 + $0xb84] ss:$16 sps:$4 sm:$0xff]  }
 0x112   : > { %2889 = vmatpush2.bf16.msra.mxu0 %v5708_v9  ;;  %v5790_v9 = vld [vmem:[%s6823_s10 + $0x980] ss:$16 sps:$4 sm:$0xff]  }
 0x113   : > { %2930 = vmatpush2.bf16.msra.mxu1 %v5711_v10  ;;  %2890 = vmatprep.subr.bf16.mxu0 %v5716_v11  ;;  %v5793_v10 = vld [vmem:[%s6823_s10 + $0xb80] ss:$16 sps:$4 sm:$0xff]   ;;  %v5798_v11 = vld [vmem:[%s6823_s10 + $0x964] ss:$16 sps:$4 sm:$0xff]  }
 0x114   : > { %2931 = vmatprep.subr.bf16.mxu1 %v5719_v12  ;;  %v5801_v12 = vld [vmem:[%s6823_s10 + $0xb64] ss:$16 sps:$4 sm:$0xff]  }
 0x116   : > { %2891 = vmatpush2.bf16.msra.mxu0 %v5714_v13  ;;  %v5796_v13 = vld [vmem:[%s6823_s10 + $0x960] ss:$16 sps:$4 sm:$0xff]  }
 0x117   : > { %2932 = vmatpush2.bf16.msra.mxu1 %v5717_v14  ;;  %2942 = vmatprep.subr.bf16.mxu0 %v5726_v15  ;;  %v5799_v14 = vld [vmem:[%s6823_s10 + $0xb60] ss:$16 sps:$4 sm:$0xff]   ;;  %v5804_v15 = vld [vmem:[%s6823_s10 + $0x944] ss:$16 sps:$4 sm:$0xff]  }
 0x118   : > { %2983 = vmatprep.subr.bf16.mxu1 %v5729_v16  ;;  %v5807_v16 = vld [vmem:[%s6823_s10 + $0xb44] ss:$16 sps:$4 sm:$0xff]  }
 0x119   : > { %2893 = vmatmul.mubr.bf16.vlgmr.msra.gmra.mxu0 %v7004_v17 }
 0x11a   : > { %2934 = vmatmul.mubr.bf16.vlgmr.msra.gmra.mxu1 %v7008_v18  ;;  %2943 = vmatpush1.bf16.msra.mxu0 %v5724_v19  ;;  %v5802_v19 = vld [vmem:[%s6823_s10 + $0x940] ss:$16 sps:$4 sm:$0xff]  }
 0x11b   : > { %2984 = vmatpush1.bf16.msra.mxu1 %v5727_v20  ;;  %2944 = vmatprep.subr.bf16.mxu0 %v5732_v21  ;;  %v5805_v20 = vld [vmem:[%s6823_s10 + $0xb40] ss:$16 sps:$4 sm:$0xff]   ;;  %v5810_v21 = vld [vmem:[%s6823_s10 + $0x924] ss:$16 sps:$4 sm:$0xff]  }
 0x11c   : > { %2985 = vmatprep.subr.bf16.mxu1 %v5735_v22  ;;  %2974 = vmatprep.mubr.bf16.mxu0 %v7022_v25  ;;  %v5813_v22 = vld [vmem:[%s6823_s10 + $0xb24] ss:$16 sps:$4 sm:$0xff]  }
 0x11d   : > { %3015 = vmatprep.mubr.bf16.mxu1 %v7026_v26 }
 0x11e   : > { %2945 = vmatpush1.bf16.msra.mxu0 %v5730_v27  ;;  %v5808_v27 = vld [vmem:[%s6823_s10 + $0x920] ss:$16 sps:$4 sm:$0xff]  }
 0x11f   : > { %2986 = vmatpush1.bf16.msra.mxu1 %v5733_v28  ;;  %2946 = vmatprep.subr.bf16.mxu0 %v5738_v29  ;;  %v5811_v28 = vld [vmem:[%s6823_s10 + $0xb20] ss:$16 sps:$4 sm:$0xff]   ;;  %v5816_v29 = vld [vmem:[%s6823_s10 + $0x904] ss:$16 sps:$4 sm:$0xff]  }
 0x120   : > { %2987 = vmatprep.subr.bf16.mxu1 %v5741_v30  ;;  %v5819_v30 = vld [vmem:[%s6823_s10 + $0xb04] ss:$16 sps:$4 sm:$0xff]  }
 0x122   : > { %2947 = vmatpush1.bf16.msra.mxu0 %v5736_v31  ;;  %v5814_v31 = vld [vmem:[%s6823_s10 + $0x900] ss:$16 sps:$4 sm:$0xff]  }
 0x123   : > { %2988 = vmatpush1.bf16.msra.mxu1 %v5739_v32  ;;  %2948 = vmatprep.subr.bf16.mxu0 %v5744_v33  ;;  %v5817_v32 = vld [vmem:[%s6823_s10 + $0xb00] ss:$16 sps:$4 sm:$0xff]   ;;  %v5826_v33 = vld [vmem:[%s6823_s10 + $0xec] ss:$16 sps:$4 sm:$0xff]  }
 0x124   : > { %2989 = vmatprep.subr.bf16.mxu1 %v5747_v34  ;;  %v5829_v34 = vld [vmem:[%s6823_s10 + $0x2ec] ss:$16 sps:$4 sm:$0xff]  }
 0x126   : > { %2949 = vmatpush1.bf16.msra.mxu0 %v5742_v35  ;;  %v7094_v35 = vcombine.low %v7015_v23, %v7015_v23  ;;  %v5830_v23 = vld [vmem:[%s6823_s10 + $0xc8] ss:$16 sps:$4 sm:$0xff]  }
 0x127   : > { %2990 = vmatpush1.bf16.msra.mxu1 %v5745_v36  ;;  %2950 = vmatprep.subr.bf16.mxu0 %v5750_v39  ;;  %v7098_v36 = vcombine.low %v7018_v24, %v7018_v24  ;;  %v5824_v39 = vld [vmem:[%s6823_s10 + $0xe8] ss:$16 sps:$4 sm:$0xff]  }
 0x128   : > { %2991 = vmatprep.subr.bf16.mxu1 %v5753_v40  ;;  %v5827_v40 = vld [vmem:[%s6823_s10 + $0x2e8] ss:$16 sps:$4 sm:$0xff]  }
 0x129   : > { %v5833_v24 = vld [vmem:[%s6823_s10 + $0x2c8] ss:$16 sps:$4 sm:$0xff]  }
 0x12a   : > { %2951 = vmatpush1.bf16.msra.mxu0 %v5748_v41  ;;  %v5832_v41 = vld [vmem:[%s6823_s10 + $0xcc] ss:$16 sps:$4 sm:$0xff]  }
 0x12b   : > { %2992 = vmatpush1.bf16.msra.mxu1 %v5751_v42  ;;  %2952 = vmatprep.subr.bf16.mxu0 %v5756_v43  ;;  %v5835_v42 = vld [vmem:[%s6823_s10 + $0x2cc] ss:$16 sps:$4 sm:$0xff]  }
 0x12c   : > { %2993 = vmatprep.subr.bf16.mxu1 %v5759_v44  ;;  %v5838_v43 = vld [vmem:[%s6823_s10 + $0xac] ss:$16 sps:$4 sm:$0xff]  }
 0x12d   : > { %v5841_v44 = vld [vmem:[%s6823_s10 + $0x2ac] ss:$16 sps:$4 sm:$0xff]  }
 0x12e   : > { %2953 = vmatpush1.bf16.msra.mxu0 %v5754_v45  ;;  %v5836_v45 = vld [vmem:[%s6823_s10 + $0xa8] ss:$16 sps:$4 sm:$0xff]  }
 0x12f   : > { %2994 = vmatpush1.bf16.msra.mxu1 %v5757_v46  ;;  %2954 = vmatprep.subr.bf16.mxu0 %v5762_v47  ;;  %v5839_v46 = vld [vmem:[%s6823_s10 + $0x2a8] ss:$16 sps:$4 sm:$0xff]   ;;  %v5844_v47 = vld [vmem:[%s6823_s10 + $0x8c] ss:$16 sps:$4 sm:$0xff]  }
 0x130   : > { %2995 = vmatprep.subr.bf16.mxu1 %v5765_v49  ;;  %v5847_v49 = vld [vmem:[%s6823_s10 + $0x28c] ss:$16 sps:$4 sm:$0xff]  }
 0x132   : > { %2955 = vmatpush1.bf16.msra.mxu0 %v5760_v50  ;;  %v5842_v50 = vld [vmem:[%s6823_s10 + $0x88] ss:$16 sps:$4 sm:$0xff]  }
 0x133   : > { %2996 = vmatpush1.bf16.msra.mxu1 %v5763_v51  ;;  %2956 = vmatprep.subr.bf16.mxu0 %v5768_v53  ;;  %v5853_v51 = vld [vmem:[%s6823_s10 + $0x26c] ss:$16 sps:$4 sm:$0xff]   ;;  %v5848_v53 = vld [vmem:[%s6823_s10 + $0x68] ss:$16 sps:$4 sm:$0xff]  }
 0x134   : > { %2997 = vmatprep.subr.bf16.mxu1 %v5771_v54  ;;  %v5851_v54 = vld [vmem:[%s6823_s10 + $0x268] ss:$16 sps:$4 sm:$0xff]  }
 0x136   : > { %2957 = vmatpush1.bf16.msra.mxu0 %v5766_v55  ;;  %v5856_v55 = vld [vmem:[%s6823_s10 + $0x4c] ss:$16 sps:$4 sm:$0xff]  }
 0x137   : > { %2998 = vmatpush1.bf16.msra.mxu1 %v5769_v56  ;;  %2958 = vmatprep.subr.bf16.mxu0 %v5774_v57  ;;  %v5859_v56 = vld [vmem:[%s6823_s10 + $0x24c] ss:$16 sps:$4 sm:$0xff]   ;;  %v5854_v57 = vld [vmem:[%s6823_s10 + $0x48] ss:$16 sps:$4 sm:$0xff]  }
 0x138   : > { %2999 = vmatprep.subr.bf16.mxu1 %v5777_v58  ;;  %v5857_v58 = vld [vmem:[%s6823_s10 + $0x248] ss:$16 sps:$4 sm:$0xff]  }
 0x13a   : > { %2959 = vmatpush2.bf16.msra.mxu0 %v5772_v59  ;;  %v5862_v59 = vld [vmem:[%s6823_s10 + $0x2c] ss:$16 sps:$4 sm:$0xff]  }
 0x13b   : > { %3000 = vmatpush2.bf16.msra.mxu1 %v5775_v60  ;;  %2960 = vmatprep.subr.bf16.mxu0 %v5780_v61  ;;  %v5865_v60 = vld [vmem:[%s6823_s10 + $0x22c] ss:$16 sps:$4 sm:$0xff]   ;;  %v5860_v61 = vld [vmem:[%s6823_s10 + $0x28] ss:$16 sps:$4 sm:$0xff]  }
 0x13c   : > { %3001 = vmatprep.subr.bf16.mxu1 %v5783_v62  ;;  %v5863_v62 = vld [vmem:[%s6823_s10 + $0x228] ss:$16 sps:$4 sm:$0xff]  }
 0x13e   : > { %2961 = vmatpush2.bf16.msra.mxu0 %v5778_v63  ;;  %v5868_v63 = vld [vmem:[%s6823_s10 + $0xc] ss:$16 sps:$4 sm:$0xff]  }
 0x13f   : > { %3002 = vmatpush2.bf16.msra.mxu1 %v5781_v0  ;;  %2962 = vmatprep.subr.bf16.mxu0 %v5786_v1  ;;  %v5871_v0 = vld [vmem:[%s6823_s10 + $0x20c] ss:$16 sps:$4 sm:$0xff]   ;;  %v5866_v1 = vld [vmem:[%s6823_s10 + $0x8] ss:$16 sps:$4 sm:$0xff]  }
 0x140   : > { %3003 = vmatprep.subr.bf16.mxu1 %v5789_v2  ;;  %v5869_v2 = vld [vmem:[%s6823_s10 + $0x208] ss:$16 sps:$4 sm:$0xff]  }
 0x142   : > { %2963 = vmatpush2.bf16.msra.mxu0 %v5784_v3  ;;  %v5874_v3 = vld [vmem:[%s6823_s10 + $0x1ec] ss:$16 sps:$4 sm:$0xff]  }
 0x143   : > { %3004 = vmatpush2.bf16.msra.mxu1 %v5787_v4  ;;  %2964 = vmatprep.subr.bf16.mxu0 %v5792_v5  ;;  %v5877_v4 = vld [vmem:[%s6823_s10 + $0x3ec] ss:$16 sps:$4 sm:$0xff]   ;;  %v5872_v5 = vld [vmem:[%s6823_s10 + $0x1e8] ss:$16 sps:$4 sm:$0xff]  }
 0x144   : > { %3005 = vmatprep.subr.bf16.mxu1 %v5795_v6  ;;  %v5875_v6 = vld [vmem:[%s6823_s10 + $0x3e8] ss:$16 sps:$4 sm:$0xff]  }
 0x146   : > { %2965 = vmatpush2.bf16.msra.mxu0 %v5790_v9  ;;  %v5880_v9 = vld [vmem:[%s6823_s10 + $0x1cc] ss:$16 sps:$4 sm:$0xff]  }
 0x147   : > { %3006 = vmatpush2.bf16.msra.mxu1 %v5793_v10  ;;  %2966 = vmatprep.subr.bf16.mxu0 %v5798_v11  ;;  %v5883_v10 = vld [vmem:[%s6823_s10 + $0x3cc] ss:$16 sps:$4 sm:$0xff]   ;;  %v5878_v11 = vld [vmem:[%s6823_s10 + $0x1c8] ss:$16 sps:$4 sm:$0xff]  }
 0x148   : > { %3007 = vmatprep.subr.bf16.mxu1 %v5801_v12  ;;  %v5881_v12 = vld [vmem:[%s6823_s10 + $0x3c8] ss:$16 sps:$4 sm:$0xff]  }
 0x14a   : > { %2967 = vmatpush2.bf16.msra.mxu0 %v5796_v13  ;;  %v5886_v13 = vld [vmem:[%s6823_s10 + $0x1ac] ss:$16 sps:$4 sm:$0xff]  }
 0x14b   : > { %3008 = vmatpush2.bf16.msra.mxu1 %v5799_v14  ;;  %2968 = vmatprep.subr.bf16.mxu0 %v5804_v15  ;;  %v5889_v14 = vld [vmem:[%s6823_s10 + $0x3ac] ss:$16 sps:$4 sm:$0xff]   ;;  %v5884_v15 = vld [vmem:[%s6823_s10 + $0x1a8] ss:$16 sps:$4 sm:$0xff]  }
 0x14c   : > { %3009 = vmatprep.subr.bf16.mxu1 %v5807_v16  ;;  %v5887_v16 = vld [vmem:[%s6823_s10 + $0x3a8] ss:$16 sps:$4 sm:$0xff]  }
 0x14e   : > { %2969 = vmatpush2.bf16.msra.mxu0 %v5802_v19  ;;  %v5892_v19 = vld [vmem:[%s6823_s10 + $0x18c] ss:$16 sps:$4 sm:$0xff]  }
 0x14f   : > { %3010 = vmatpush2.bf16.msra.mxu1 %v5805_v20  ;;  %2970 = vmatprep.subr.bf16.mxu0 %v5810_v21  ;;  %v5895_v20 = vld [vmem:[%s6823_s10 + $0x38c] ss:$16 sps:$4 sm:$0xff]   ;;  %v5890_v21 = vld [vmem:[%s6823_s10 + $0x188] ss:$16 sps:$4 sm:$0xff]  }
 0x150   : > { %3011 = vmatprep.subr.bf16.mxu1 %v5813_v22  ;;  %v5893_v22 = vld [vmem:[%s6823_s10 + $0x388] ss:$16 sps:$4 sm:$0xff]  }
 0x152   : > { %2971 = vmatpush2.bf16.msra.mxu0 %v5808_v27  ;;  %v5898_v27 = vld [vmem:[%s6823_s10 + $0x16c] ss:$16 sps:$4 sm:$0xff]  }
 0x153   : > { %3012 = vmatpush2.bf16.msra.mxu1 %v5811_v28  ;;  %2972 = vmatprep.subr.bf16.mxu0 %v5816_v29  ;;  %v5901_v28 = vld [vmem:[%s6823_s10 + $0x36c] ss:$16 sps:$4 sm:$0xff]   ;;  %v5896_v29 = vld [vmem:[%s6823_s10 + $0x168] ss:$16 sps:$4 sm:$0xff]  }
 0x154   : > { %3013 = vmatprep.subr.bf16.mxu1 %v5819_v30  ;;  %v5899_v30 = vld [vmem:[%s6823_s10 + $0x368] ss:$16 sps:$4 sm:$0xff]  }
 0x156   : > { %2973 = vmatpush2.bf16.msra.mxu0 %v5814_v31  ;;  %v5904_v31 = vld [vmem:[%s6823_s10 + $0x14c] ss:$16 sps:$4 sm:$0xff]  }
 0x157   : > { %3014 = vmatpush2.bf16.msra.mxu1 %v5817_v32  ;;  %3024 = vmatprep.subr.bf16.mxu0 %v5826_v33  ;;  %v5907_v32 = vld [vmem:[%s6823_s10 + $0x34c] ss:$16 sps:$4 sm:$0xff]   ;;  %v5902_v33 = vld [vmem:[%s6823_s10 + $0x148] ss:$16 sps:$4 sm:$0xff]  }
 0x158   : > { %3065 = vmatprep.subr.bf16.mxu1 %v5829_v34  ;;  %v5905_v34 = vld [vmem:[%s6823_s10 + $0x348] ss:$16 sps:$4 sm:$0xff]  }
 0x159   : > { %2975 = vmatmul.mubr.bf16.vlgmr.msra.gmra.mxu0 %v7094_v35 }
 0x15a   : > { %3016 = vmatmul.mubr.bf16.vlgmr.msra.gmra.mxu1 %v7098_v36  ;;  %3025 = vmatpush1.bf16.msra.mxu0 %v5824_v39  ;;  %v5910_v39 = vld [vmem:[%s6823_s10 + $0x12c] ss:$16 sps:$4 sm:$0xff]  }
 0x15b   : > { %3066 = vmatpush1.bf16.msra.mxu1 %v5827_v40  ;;  %3026 = vmatprep.subr.bf16.mxu0 %v5832_v41  ;;  %v5913_v40 = vld [vmem:[%s6823_s10 + $0x32c] ss:$16 sps:$4 sm:$0xff]   ;;  %v5908_v41 = vld [vmem:[%s6823_s10 + $0x128] ss:$16 sps:$4 sm:$0xff]  }
 0x15c   : > { %3067 = vmatprep.subr.bf16.mxu1 %v5835_v42  ;;  %3056 = vmatprep.mubr.bf16.mxu0 %v6889_v48  ;;  %v5845_v48 = vld [vmem:[%s6823_s10 + $0x288] ss:$16 sps:$4 sm:$0xff]  }
 0x15d   : > { %3097 = vmatprep.mubr.bf16.mxu1 %v6894_v52  ;;  %v5850_v52 = vld [vmem:[%s6823_s10 + $0x6c] ss:$16 sps:$4 sm:$0xff]   ;;  %v5911_v42 = vld [vmem:[%s6823_s10 + $0x328] ss:$16 sps:$4 sm:$0xff]  }
 0x15e   : > { %3027 = vmatpush1.bf16.msra.mxu0 %v5830_v23  ;;  %v5916_v23 = vld [vmem:[%s6823_s10 + $0x10c] ss:$16 sps:$4 sm:$0xff]  }
 0x15f   : > { %3068 = vmatpush1.bf16.msra.mxu1 %v5833_v24  ;;  %3028 = vmatprep.subr.bf16.mxu0 %v5838_v43  ;;  %v5919_v24 = vld [vmem:[%s6823_s10 + $0x30c] ss:$16 sps:$4 sm:$0xff]   ;;  %v5914_v43 = vld [vmem:[%s6823_s10 + $0x108] ss:$16 sps:$4 sm:$0xff]  }
 0x160   : > { %3069 = vmatprep.subr.bf16.mxu1 %v5841_v44  ;;  %v5917_v44 = vld [vmem:[%s6823_s10 + $0x308] ss:$16 sps:$4 sm:$0xff]  }
 0x162   : > { %3029 = vmatpush1.bf16.msra.mxu0 %v5836_v45  ;;  %v5922_v45 = vld [vmem:[%s6823_s10 + $0x4ec] ss:$16 sps:$4 sm:$0xff]  }
 0x163   : > { %3070 = vmatpush1.bf16.msra.mxu1 %v5839_v46  ;;  %3030 = vmatprep.subr.bf16.mxu0 %v5844_v47  ;;  %v5925_v46 = vld [vmem:[%s6823_s10 + $0x6ec] ss:$16 sps:$4 sm:$0xff]   ;;  %v5920_v47 = vld [vmem:[%s6823_s10 + $0x4e8] ss:$16 sps:$4 sm:$0xff]  }
 0x164   : > { %3071 = vmatprep.subr.bf16.mxu1 %v5847_v49  ;;  %v5923_v49 = vld [vmem:[%s6823_s10 + $0x6e8] ss:$16 sps:$4 sm:$0xff]  }
 0x166   : > { %3031 = vmatpush1.bf16.msra.mxu0 %v5842_v50  ;;  %v5928_v50 = vld [vmem:[%s6823_s10 + $0x4cc] ss:$16 sps:$4 sm:$0xff]  }
 0x167   : > { %3072 = vmatpush1.bf16.msra.mxu1 %v5845_v48  ;;  %3032 = vmatprep.subr.bf16.mxu0 %v5850_v52  ;;  %v5931_v48 = vld [vmem:[%s6823_s10 + $0x6cc] ss:$16 sps:$4 sm:$0xff]  }
 0x168   : > { %3073 = vmatprep.subr.bf16.mxu1 %v5853_v51 }
 0x16a   : > { %3033 = vmatpush1.bf16.msra.mxu0 %v5848_v53 }
 0x16b   : > { %3074 = vmatpush1.bf16.msra.mxu1 %v5851_v54  ;;  %3034 = vmatprep.subr.bf16.mxu0 %v5856_v55  ;;  %v5926_v54 = vld [vmem:[%s6823_s10 + $0x4c8] ss:$16 sps:$4 sm:$0xff]  }
 0x16c   : > { %3075 = vmatprep.subr.bf16.mxu1 %v5859_v56  ;;  %v5929_v55 = vld [vmem:[%s6823_s10 + $0x6c8] ss:$16 sps:$4 sm:$0xff]  }
 0x16e   : > { %3035 = vmatpush1.bf16.msra.mxu0 %v5854_v57 }
 0x16f   : > { %3076 = vmatpush1.bf16.msra.mxu1 %v5857_v58  ;;  %3036 = vmatprep.subr.bf16.mxu0 %v5862_v59  ;;  %v5934_v58 = vld [vmem:[%s6823_s10 + $0x4ac] ss:$16 sps:$4 sm:$0xff]  }
 0x170   : > { %3077 = vmatprep.subr.bf16.mxu1 %v5865_v60  ;;  %v5937_v59 = vld [vmem:[%s6823_s10 + $0x6ac] ss:$16 sps:$4 sm:$0xff]  }
 0x172   : > { %3037 = vmatpush1.bf16.msra.mxu0 %v5860_v61  ;;  %v5932_v61 = vld [vmem:[%s6823_s10 + $0x4a8] ss:$16 sps:$4 sm:$0xff]  }
 0x173   : > { %3078 = vmatpush1.bf16.msra.mxu1 %v5863_v62  ;;  %3038 = vmatprep.subr.bf16.mxu0 %v5868_v63  ;;  %v5935_v62 = vld [vmem:[%s6823_s10 + $0x6a8] ss:$16 sps:$4 sm:$0xff]  }
 0x174   : > { %3079 = vmatprep.subr.bf16.mxu1 %v5871_v0 }
 0x176   : > { %3039 = vmatpush1.bf16.msra.mxu0 %v5866_v1  ;;  %v5940_v1 = vld [vmem:[%s6823_s10 + $0x48c] ss:$16 sps:$4 sm:$0xff]  }
 0x177   : > { %3080 = vmatpush1.bf16.msra.mxu1 %v5869_v2  ;;  %3040 = vmatprep.subr.bf16.mxu0 %v5874_v3  ;;  %v5941_v2 = vld [vmem:[%s6823_s10 + $0x688] ss:$16 sps:$4 sm:$0xff]   ;;  %v5946_v3 = vld [vmem:[%s6823_s10 + $0x46c] ss:$16 sps:$4 sm:$0xff]  }
 0x178   : > { %3081 = vmatprep.subr.bf16.mxu1 %v5877_v4  ;;  %v5949_v4 = vld [vmem:[%s6823_s10 + $0x66c] ss:$16 sps:$4 sm:$0xff]  }
 0x17a   : > { %3041 = vmatpush2.bf16.msra.mxu0 %v5872_v5  ;;  %v5944_v5 = vld [vmem:[%s6823_s10 + $0x468] ss:$16 sps:$4 sm:$0xff]  }
 0x17b   : > { %3082 = vmatpush2.bf16.msra.mxu1 %v5875_v6  ;;  %3042 = vmatprep.subr.bf16.mxu0 %v5880_v9  ;;  %v5947_v6 = vld [vmem:[%s6823_s10 + $0x668] ss:$16 sps:$4 sm:$0xff]   ;;  %v5952_v9 = vld [vmem:[%s6823_s10 + $0x44c] ss:$16 sps:$4 sm:$0xff]  }
 0x17c   : > { %3083 = vmatprep.subr.bf16.mxu1 %v5883_v10  ;;  %v5955_v10 = vld [vmem:[%s6823_s10 + $0x64c] ss:$16 sps:$4 sm:$0xff]  }
 0x17e   : > { %3043 = vmatpush2.bf16.msra.mxu0 %v5878_v11  ;;  %v5950_v11 = vld [vmem:[%s6823_s10 + $0x448] ss:$16 sps:$4 sm:$0xff]  }
 0x17f   : > { %3084 = vmatpush2.bf16.msra.mxu1 %v5881_v12  ;;  %3044 = vmatprep.subr.bf16.mxu0 %v5886_v13  ;;  %v5953_v12 = vld [vmem:[%s6823_s10 + $0x648] ss:$16 sps:$4 sm:$0xff]   ;;  %v5958_v13 = vld [vmem:[%s6823_s10 + $0x42c] ss:$16 sps:$4 sm:$0xff]  }
 0x180   : > { %3085 = vmatprep.subr.bf16.mxu1 %v5889_v14  ;;  %v5961_v14 = vld [vmem:[%s6823_s10 + $0x62c] ss:$16 sps:$4 sm:$0xff]  }
 0x182   : > { %3045 = vmatpush2.bf16.msra.mxu0 %v5884_v15  ;;  %v5956_v15 = vld [vmem:[%s6823_s10 + $0x428] ss:$16 sps:$4 sm:$0xff]  }
 0x183   : > { %3086 = vmatpush2.bf16.msra.mxu1 %v5887_v16  ;;  %3046 = vmatprep.subr.bf16.mxu0 %v5892_v19  ;;  %v5959_v16 = vld [vmem:[%s6823_s10 + $0x628] ss:$16 sps:$4 sm:$0xff]   ;;  %v5964_v19 = vld [vmem:[%s6823_s10 + $0x40c] ss:$16 sps:$4 sm:$0xff]  }
 0x184   : > { %3087 = vmatprep.subr.bf16.mxu1 %v5895_v20  ;;  %v5967_v20 = vld [vmem:[%s6823_s10 + $0x60c] ss:$16 sps:$4 sm:$0xff]  }
 0x186   : > { %3047 = vmatpush2.bf16.msra.mxu0 %v5890_v21  ;;  %v5962_v21 = vld [vmem:[%s6823_s10 + $0x408] ss:$16 sps:$4 sm:$0xff]  }
 0x187   : > { %3088 = vmatpush2.bf16.msra.mxu1 %v5893_v22  ;;  %3048 = vmatprep.subr.bf16.mxu0 %v5898_v27  ;;  %v5965_v22 = vld [vmem:[%s6823_s10 + $0x608] ss:$16 sps:$4 sm:$0xff]   ;;  %v5970_v27 = vld [vmem:[%s6823_s10 + $0x5ec] ss:$16 sps:$4 sm:$0xff]  }
 0x188   : > { %3089 = vmatprep.subr.bf16.mxu1 %v5901_v28  ;;  %v5973_v28 = vld [vmem:[%s6823_s10 + $0x7ec] ss:$16 sps:$4 sm:$0xff]  }
 0x18a   : > { %3049 = vmatpush2.bf16.msra.mxu0 %v5896_v29  ;;  %v5968_v29 = vld [vmem:[%s6823_s10 + $0x5e8] ss:$16 sps:$4 sm:$0xff]  }
 0x18b   : > { %3090 = vmatpush2.bf16.msra.mxu1 %v5899_v30  ;;  %3050 = vmatprep.subr.bf16.mxu0 %v5904_v31  ;;  %v5971_v30 = vld [vmem:[%s6823_s10 + $0x7e8] ss:$16 sps:$4 sm:$0xff]   ;;  %v5976_v31 = vld [vmem:[%s6823_s10 + $0x5cc] ss:$16 sps:$4 sm:$0xff]  }
 0x18c   : > { %3091 = vmatprep.subr.bf16.mxu1 %v5907_v32  ;;  %v5979_v32 = vld [vmem:[%s6823_s10 + $0x7cc] ss:$16 sps:$4 sm:$0xff]  }
 0x18e   : > { %3051 = vmatpush2.bf16.msra.mxu0 %v5902_v33  ;;  %v5974_v33 = vld [vmem:[%s6823_s10 + $0x5c8] ss:$16 sps:$4 sm:$0xff]  }
 0x18f   : > { %3092 = vmatpush2.bf16.msra.mxu1 %v5905_v34  ;;  %3052 = vmatprep.subr.bf16.mxu0 %v5910_v39  ;;  %v5977_v34 = vld [vmem:[%s6823_s10 + $0x7c8] ss:$16 sps:$4 sm:$0xff]   ;;  %v5982_v39 = vld [vmem:[%s6823_s10 + $0x5ac] ss:$16 sps:$4 sm:$0xff]  }
 0x190   : > { %3093 = vmatprep.subr.bf16.mxu1 %v5913_v40  ;;  %v5985_v40 = vld [vmem:[%s6823_s10 + $0x7ac] ss:$16 sps:$4 sm:$0xff]  }
 0x192   : > { %3053 = vmatpush2.bf16.msra.mxu0 %v5908_v41  ;;  %v5980_v41 = vld [vmem:[%s6823_s10 + $0x5a8] ss:$16 sps:$4 sm:$0xff]  }
 0x193   : > { %3094 = vmatpush2.bf16.msra.mxu1 %v5911_v42  ;;  %3054 = vmatprep.subr.bf16.mxu0 %v5916_v23  ;;  %v5983_v42 = vld [vmem:[%s6823_s10 + $0x7a8] ss:$16 sps:$4 sm:$0xff]   ;;  %v5988_v23 = vld [vmem:[%s6823_s10 + $0x58c] ss:$16 sps:$4 sm:$0xff]  }
 0x194   : > { %3095 = vmatprep.subr.bf16.mxu1 %v5919_v24  ;;  %v5991_v24 = vld [vmem:[%s6823_s10 + $0x78c] ss:$16 sps:$4 sm:$0xff]  }
 0x196   : > { %3055 = vmatpush2.bf16.msra.mxu0 %v5914_v43  ;;  %v5986_v43 = vld [vmem:[%s6823_s10 + $0x588] ss:$16 sps:$4 sm:$0xff]  }
 0x197   : > { %3096 = vmatpush2.bf16.msra.mxu1 %v5917_v44  ;;  %3106 = vmatprep.subr.bf16.mxu0 %v5922_v45  ;;  %v5989_v44 = vld [vmem:[%s6823_s10 + $0x788] ss:$16 sps:$4 sm:$0xff]   ;;  %v5994_v45 = vld [vmem:[%s6823_s10 + $0x56c] ss:$16 sps:$4 sm:$0xff]  }
 0x198   : > { %3147 = vmatprep.subr.bf16.mxu1 %v5925_v46  ;;  %v5997_v46 = vld [vmem:[%s6823_s10 + $0x76c] ss:$16 sps:$4 sm:$0xff]  }
 0x199   : > { %v2812_v52 = vpop.f32.mrf.mxu0  ;;  %3057 = vmatmul.mubr.bf16.vlgmr.msra.gmra.mxu0 %v6916_v7 }
 0x19a   : > { %v2853_v51 = vpop.f32.mrf.mxu1  ;;  %3098 = vmatmul.mubr.bf16.vlgmr.msra.gmra.mxu1 %v6918_v8  ;;  %3107 = vmatpush1.bf16.msra.mxu0 %v5920_v47  ;;  %v5992_v47 = vld [vmem:[%s6823_s10 + $0x568] ss:$16 sps:$4 sm:$0xff]  }
 0x19b   : > { %v7174_v53 = vadd.f32 %v2853_v51, %v2812_v52  ;;  %3148 = vmatpush1.bf16.msra.mxu1 %v5923_v49  ;;  %v2814_v56 = vpop.f32.mrf.mxu0  ;;  %3108 = vmatprep.subr.bf16.mxu0 %v5928_v50  ;;  %v5995_v49 = vld [vmem:[%s6823_s10 + $0x768] ss:$16 sps:$4 sm:$0xff]   ;;  %v6000_v50 = vld [vmem:[%s6823_s10 + $0x54c] ss:$16 sps:$4 sm:$0xff]  }
 0x19c   : > { %v2855_v57 = vpop.f32.mrf.mxu1  ;;  %3149 = vmatprep.subr.bf16.mxu1 %v5931_v48  ;;  %3138 = vmatprep.mubr.bf16.mxu0 %v6956_v37  ;;  %v5943_v37 = vld [vmem:[%s6823_s10 + $0x68c] ss:$16 sps:$4 sm:$0xff]   ;;  %v5998_v52 = vld [vmem:[%s6823_s10 + $0x548] ss:$16 sps:$4 sm:$0xff]  }
 0x19d   : > { %v7180_v60 = vadd.f32 %v2855_v57, %v2814_v56  ;;  %3179 = vmatprep.mubr.bf16.mxu1 %v6960_v38  ;;  %v2816_v7 = vpop.f32.mrf.mxu0  ;;  %v5938_v38 = vld [vmem:[%s6823_s10 + $0x488] ss:$16 sps:$4 sm:$0xff]   ;;  %v6003_v48 = vld [vmem:[%s6823_s10 + $0x74c] ss:$16 sps:$4 sm:$0xff]  }
 0x19e   : > { %v2857_v8 = vpop.f32.mrf.mxu1  ;;  %3109 = vmatpush1.bf16.msra.mxu0 %v5926_v54  ;;  %v6001_v51 = vld [vmem:[%s6823_s10 + $0x748] ss:$16 sps:$4 sm:$0xff]   ;;  %v6006_v54 = vld [vmem:[%s6823_s10 + $0x52c] ss:$16 sps:$4 sm:$0xff]  }
 0x19f   : > { %3150 = vmatpush1.bf16.msra.mxu1 %v5929_v55  ;;  %v2817_v63 = vpop.f32.mrf.mxu0  ;;  %3110 = vmatprep.subr.bf16.mxu0 %v5934_v58  ;;  %v6009_v55 = vld [vmem:[%s6823_s10 + $0x72c] ss:$16 sps:$4 sm:$0xff]   ;;  %v6004_v56 = vld [vmem:[%s6823_s10 + $0x528] ss:$16 sps:$4 sm:$0xff]  }
 0x1a0   : > { %v2858_v0 = vpop.f32.mrf.mxu1  ;;  %3151 = vmatprep.subr.bf16.mxu1 %v5937_v59  ;;  %v6007_v57 = vld [vmem:[%s6823_s10 + $0x728] ss:$16 sps:$4 sm:$0xff]   ;;  %v6012_v58 = vld [vmem:[%s6823_s10 + $0x50c] ss:$16 sps:$4 sm:$0xff]  }
 0x1a1   : > { %v6015_v59 = vld [vmem:[%s6823_s10 + $0x70c] ss:$16 sps:$4 sm:$0xff]   ;;  %v6010_v7 = vld [vmem:[%s6823_s10 + $0x508] ss:$16 sps:$4 sm:$0xff]  }
 0x1a2   : > { %3111 = vmatpush1.bf16.msra.mxu0 %v5932_v61  ;;  %v6013_v8 = vld [vmem:[%s6823_s10 + $0x708] ss:$16 sps:$4 sm:$0xff]   ;;  %v6018_v61 = vld [vmem:[%s6823_s10 + $0x8ec] ss:$16 sps:$4 sm:$0xff]  }
 0x1a3   : > { %3152 = vmatpush1.bf16.msra.mxu1 %v5935_v62  ;;  %3112 = vmatprep.subr.bf16.mxu0 %v5940_v1  ;;  %v6021_v62 = vld [vmem:[%s6823_s10 + $0xaec] ss:$16 sps:$4 sm:$0xff]   ;;  %v6016_v63 = vld [vmem:[%s6823_s10 + $0x8e8] ss:$16 sps:$4 sm:$0xff]  }
 0x1a4   : > { %3153 = vmatprep.subr.bf16.mxu1 %v5943_v37  ;;  %v6019_v0 = vld [vmem:[%s6823_s10 + $0xae8] ss:$16 sps:$4 sm:$0xff]   ;;  %v6024_v1 = vld [vmem:[%s6823_s10 + $0x8cc] ss:$16 sps:$4 sm:$0xff]  }
 0x1a5   : > { %v6027_v37 = vld [vmem:[%s6823_s10 + $0xacc] ss:$16 sps:$4 sm:$0xff]  }
 0x1a6   : > { %3113 = vmatpush1.bf16.msra.mxu0 %v5938_v38 }
 0x1a7   : > { %3154 = vmatpush1.bf16.msra.mxu1 %v5941_v2  ;;  %3114 = vmatprep.subr.bf16.mxu0 %v5946_v3  ;;  %v6022_v3 = vld [vmem:[%s6823_s10 + $0x8c8] ss:$16 sps:$4 sm:$0xff]  }
 0x1a8   : > { %3155 = vmatprep.subr.bf16.mxu1 %v5949_v4  ;;  %v6025_v4 = vld [vmem:[%s6823_s10 + $0xac8] ss:$16 sps:$4 sm:$0xff]  }
 0x1aa   : > { %3115 = vmatpush1.bf16.msra.mxu0 %v5944_v5 }
 0x1ab   : > { %3156 = vmatpush1.bf16.msra.mxu1 %v5947_v6  ;;  %3116 = vmatprep.subr.bf16.mxu0 %v5952_v9  ;;  %v6030_v9 = vld [vmem:[%s6823_s10 + $0x8ac] ss:$16 sps:$4 sm:$0xff]  }
 0x1ac   : > { %3157 = vmatprep.subr.bf16.mxu1 %v5955_v10  ;;  %v6033_v10 = vld [vmem:[%s6823_s10 + $0xaac] ss:$16 sps:$4 sm:$0xff]  }
 0x1ae   : > { %3117 = vmatpush1.bf16.msra.mxu0 %v5950_v11  ;;  %v6028_v11 = vld [vmem:[%s6823_s10 + $0x8a8] ss:$16 sps:$4 sm:$0xff]  }
 0x1af   : > { %3158 = vmatpush1.bf16.msra.mxu1 %v5953_v12  ;;  %3118 = vmatprep.subr.bf16.mxu0 %v5958_v13  ;;  %v6031_v12 = vld [vmem:[%s6823_s10 + $0xaa8] ss:$16 sps:$4 sm:$0xff]  }
 0x1b0   : > { %3159 = vmatprep.subr.bf16.mxu1 %v5961_v14 }
 0x1b2   : > { %3119 = vmatpush1.bf16.msra.mxu0 %v5956_v15  ;;  %v6036_v15 = vld [vmem:[%s6823_s10 + $0x88c] ss:$16 sps:$4 sm:$0xff]  }
 0x1b3   : > { %3160 = vmatpush1.bf16.msra.mxu1 %v5959_v16  ;;  %3120 = vmatprep.subr.bf16.mxu0 %v5964_v19  ;;  %v6037_v16 = vld [vmem:[%s6823_s10 + $0xa88] ss:$16 sps:$4 sm:$0xff]   ;;  %v6042_v19 = vld [vmem:[%s6823_s10 + $0x86c] ss:$16 sps:$4 sm:$0xff]  }
 0x1b4   : > { %3161 = vmatprep.subr.bf16.mxu1 %v5967_v20  ;;  %v6045_v20 = vld [vmem:[%s6823_s10 + $0xa6c] ss:$16 sps:$4 sm:$0xff]  }
 0x1b6   : > { %3121 = vmatpush1.bf16.msra.mxu0 %v5962_v21  ;;  %v6040_v21 = vld [vmem:[%s6823_s10 + $0x868] ss:$16 sps:$4 sm:$0xff]  }
 0x1b7   : > { %3162 = vmatpush1.bf16.msra.mxu1 %v5965_v22  ;;  %3122 = vmatprep.subr.bf16.mxu0 %v5970_v27  ;;  %v6043_v22 = vld [vmem:[%s6823_s10 + $0xa68] ss:$16 sps:$4 sm:$0xff]   ;;  %v6048_v27 = vld [vmem:[%s6823_s10 + $0x84c] ss:$16 sps:$4 sm:$0xff]  }
 0x1b8   : > { %3163 = vmatprep.subr.bf16.mxu1 %v5973_v28  ;;  %v6051_v28 = vld [vmem:[%s6823_s10 + $0xa4c] ss:$16 sps:$4 sm:$0xff]  }
 0x1ba   : > { %3123 = vmatpush2.bf16.msra.mxu0 %v5968_v29  ;;  %v6046_v29 = vld [vmem:[%s6823_s10 + $0x848] ss:$16 sps:$4 sm:$0xff]  }
 0x1bb   : > { %3164 = vmatpush2.bf16.msra.mxu1 %v5971_v30  ;;  %3124 = vmatprep.subr.bf16.mxu0 %v5976_v31  ;;  %v6049_v30 = vld [vmem:[%s6823_s10 + $0xa48] ss:$16 sps:$4 sm:$0xff]   ;;  %v6054_v31 = vld [vmem:[%s6823_s10 + $0x82c] ss:$16 sps:$4 sm:$0xff]  }
 0x1bc   : > { %3165 = vmatprep.subr.bf16.mxu1 %v5979_v32  ;;  %v6057_v32 = vld [vmem:[%s6823_s10 + $0xa2c] ss:$16 sps:$4 sm:$0xff]  }
 0x1be   : > { %3125 = vmatpush2.bf16.msra.mxu0 %v5974_v33  ;;  %v6052_v33 = vld [vmem:[%s6823_s10 + $0x828] ss:$16 sps:$4 sm:$0xff]  }
 0x1bf   : > { %3166 = vmatpush2.bf16.msra.mxu1 %v5977_v34  ;;  %3126 = vmatprep.subr.bf16.mxu0 %v5982_v39  ;;  %v6055_v34 = vld [vmem:[%s6823_s10 + $0xa28] ss:$16 sps:$4 sm:$0xff]   ;;  %v6060_v39 = vld [vmem:[%s6823_s10 + $0x80c] ss:$16 sps:$4 sm:$0xff]  }
 0x1c0   : > { %3167 = vmatprep.subr.bf16.mxu1 %v5985_v40  ;;  %v6063_v40 = vld [vmem:[%s6823_s10 + $0xa0c] ss:$16 sps:$4 sm:$0xff]  }
 0x1c2   : > { %3127 = vmatpush2.bf16.msra.mxu0 %v5980_v41  ;;  %v6058_v41 = vld [vmem:[%s6823_s10 + $0x808] ss:$16 sps:$4 sm:$0xff]  }
 0x1c3   : > { %3168 = vmatpush2.bf16.msra.mxu1 %v5983_v42  ;;  %3128 = vmatprep.subr.bf16.mxu0 %v5988_v23  ;;  %v6061_v42 = vld [vmem:[%s6823_s10 + $0xa08] ss:$16 sps:$4 sm:$0xff]   ;;  %v6066_v23 = vld [vmem:[%s6823_s10 + $0x9ec] ss:$16 sps:$4 sm:$0xff]  }
 0x1c4   : > { %3169 = vmatprep.subr.bf16.mxu1 %v5991_v24  ;;  %v6069_v24 = vld [vmem:[%s6823_s10 + $0xbec] ss:$16 sps:$4 sm:$0xff]  }
 0x1c6   : > { %3129 = vmatpush2.bf16.msra.mxu0 %v5986_v43  ;;  %v6064_v43 = vld [vmem:[%s6823_s10 + $0x9e8] ss:$16 sps:$4 sm:$0xff]  }
 0x1c7   : > { %3170 = vmatpush2.bf16.msra.mxu1 %v5989_v44  ;;  %3130 = vmatprep.subr.bf16.mxu0 %v5994_v45  ;;  %v6067_v44 = vld [vmem:[%s6823_s10 + $0xbe8] ss:$16 sps:$4 sm:$0xff]   ;;  %v6072_v45 = vld [vmem:[%s6823_s10 + $0x9cc] ss:$16 sps:$4 sm:$0xff]  }
 0x1c8   : > { %3171 = vmatprep.subr.bf16.mxu1 %v5997_v46  ;;  %v6075_v46 = vld [vmem:[%s6823_s10 + $0xbcc] ss:$16 sps:$4 sm:$0xff]  }
 0x1ca   : > { %3131 = vmatpush2.bf16.msra.mxu0 %v5992_v47  ;;  %v6070_v47 = vld [vmem:[%s6823_s10 + $0x9c8] ss:$16 sps:$4 sm:$0xff]  }
 0x1cb   : > { %3172 = vmatpush2.bf16.msra.mxu1 %v5995_v49  ;;  %3132 = vmatprep.subr.bf16.mxu0 %v6000_v50  ;;  %v6073_v49 = vld [vmem:[%s6823_s10 + $0xbc8] ss:$16 sps:$4 sm:$0xff]   ;;  %v6078_v50 = vld [vmem:[%s6823_s10 + $0x9ac] ss:$16 sps:$4 sm:$0xff]  }
 0x1cc   : > { %3173 = vmatprep.subr.bf16.mxu1 %v6003_v48  ;;  %v6081_v48 = vld [vmem:[%s6823_s10 + $0xbac] ss:$16 sps:$4 sm:$0xff]  }
 0x1ce   : > { %3133 = vmatpush2.bf16.msra.mxu0 %v5998_v52  ;;  %v6076_v52 = vld [vmem:[%s6823_s10 + $0x9a8] ss:$16 sps:$4 sm:$0xff]  }
 0x1cf   : > { %3174 = vmatpush2.bf16.msra.mxu1 %v6001_v51  ;;  %3134 = vmatprep.subr.bf16.mxu0 %v6006_v54  ;;  %v6079_v51 = vld [vmem:[%s6823_s10 + $0xba8] ss:$16 sps:$4 sm:$0xff]   ;;  %v6084_v54 = vld [vmem:[%s6823_s10 + $0x98c] ss:$16 sps:$4 sm:$0xff]  }
 0x1d0   : > { %3175 = vmatprep.subr.bf16.mxu1 %v6009_v55  ;;  %v6087_v55 = vld [vmem:[%s6823_s10 + $0xb8c] ss:$16 sps:$4 sm:$0xff]  }
 0x1d2   : > { %3135 = vmatpush2.bf16.msra.mxu0 %v6004_v56  ;;  %v6082_v56 = vld [vmem:[%s6823_s10 + $0x988] ss:$16 sps:$4 sm:$0xff]  }
 0x1d3   : > { %3176 = vmatpush2.bf16.msra.mxu1 %v6007_v57  ;;  %3136 = vmatprep.subr.bf16.mxu0 %v6012_v58  ;;  %v6085_v57 = vld [vmem:[%s6823_s10 + $0xb88] ss:$16 sps:$4 sm:$0xff]   ;;  %v6090_v58 = vld [vmem:[%s6823_s10 + $0x96c] ss:$16 sps:$4 sm:$0xff]  }
 0x1d4   : > { %3177 = vmatprep.subr.bf16.mxu1 %v6015_v59  ;;  %v6093_v59 = vld [vmem:[%s6823_s10 + $0xb6c] ss:$16 sps:$4 sm:$0xff]  }
 0x1d6   : > { %3137 = vmatpush2.bf16.msra.mxu0 %v6010_v7  ;;  %v6088_v7 = vld [vmem:[%s6823_s10 + $0x968] ss:$16 sps:$4 sm:$0xff]  }
 0x1d7   : > { %3178 = vmatpush2.bf16.msra.mxu1 %v6013_v8  ;;  %3188 = vmatprep.subr.bf16.mxu0 %v6018_v61  ;;  %v6091_v8 = vld [vmem:[%s6823_s10 + $0xb68] ss:$16 sps:$4 sm:$0xff]   ;;  %v6096_v61 = vld [vmem:[%s6823_s10 + $0x94c] ss:$16 sps:$4 sm:$0xff]  }
 0x1d8   : > { %3229 = vmatprep.subr.bf16.mxu1 %v6021_v62  ;;  %v6099_v62 = vld [vmem:[%s6823_s10 + $0xb4c] ss:$16 sps:$4 sm:$0xff]  }
 0x1d9   : > { %v7244_v38 = vpop.f32.mrf.mxu0  ;;  %3139 = vmatmul.mubr.bf16.vlgmr.msra.gmra.mxu0 %v7004_v17 }
 0x1da   : > { %v7246_v2 = vpop.f32.mrf.mxu1  ;;  %3180 = vmatmul.mubr.bf16.vlgmr.msra.gmra.mxu1 %v7008_v18  ;;  %3189 = vmatpush1.bf16.msra.mxu0 %v6016_v63  ;;  %v6094_v63 = vld [vmem:[%s6823_s10 + $0x948] ss:$16 sps:$4 sm:$0xff]  }
 0x1db   : > { %3230 = vmatpush1.bf16.msra.mxu1 %v6019_v0  ;;  %v7252_v5 = vpop.f32.mrf.mxu0  ;;  %3190 = vmatprep.subr.bf16.mxu0 %v6024_v1  ;;  %v6097_v0 = vld [vmem:[%s6823_s10 + $0xb48] ss:$16 sps:$4 sm:$0xff]   ;;  %v6102_v1 = vld [vmem:[%s6823_s10 + $0x92c] ss:$16 sps:$4 sm:$0xff]  }
 0x1dc   : > { %v7254_v6 = vpop.f32.mrf.mxu1  ;;  %3231 = vmatprep.subr.bf16.mxu1 %v6027_v37  ;;  %3220 = vmatprep.mubr.bf16.mxu0 %v7022_v25  ;;  %v6039_v25 = vld [vmem:[%s6823_s10 + $0xa8c] ss:$16 sps:$4 sm:$0xff]  }
 0x1dd   : > { %3261 = vmatprep.mubr.bf16.mxu1 %v7026_v26  ;;  %v2898_v17 = vpop.f32.mrf.mxu0  ;;  %v6034_v26 = vld [vmem:[%s6823_s10 + $0x888] ss:$16 sps:$4 sm:$0xff]   ;;  %v6105_v37 = vld [vmem:[%s6823_s10 + $0xb2c] ss:$16 sps:$4 sm:$0xff]  }
 0x1de   : > { %v2939_v18 = vpop.f32.mrf.mxu1  ;;  %3191 = vmatpush1.bf16.msra.mxu0 %v6022_v3  ;;  %v6100_v3 = vld [vmem:[%s6823_s10 + $0x928] ss:$16 sps:$4 sm:$0xff]  }
 0x1df   : > { %3232 = vmatpush1.bf16.msra.mxu1 %v6025_v4  ;;  %v2899_v13 = vpop.f32.mrf.mxu0  ;;  %3192 = vmatprep.subr.bf16.mxu0 %v6030_v9  ;;  %v6103_v4 = vld [vmem:[%s6823_s10 + $0xb28] ss:$16 sps:$4 sm:$0xff]   ;;  %v6108_v9 = vld [vmem:[%s6823_s10 + $0x90c] ss:$16 sps:$4 sm:$0xff]  }
 0x1e0   : > { %v2940_v14 = vpop.f32.mrf.mxu1  ;;  %3233 = vmatprep.subr.bf16.mxu1 %v6033_v10  ;;  %v6111_v10 = vld [vmem:[%s6823_s10 + $0xb0c] ss:$16 sps:$4 sm:$0xff]   ;;  %v6106_v17 = vld [vmem:[%s6823_s10 + $0x908] ss:$16 sps:$4 sm:$0xff]  }
 0x1e1   : > { %v6109_v18 = vld [vmem:[%s6823_s10 + $0xb08] ss:$16 sps:$4 sm:$0xff]  }
 0x1e2   : > { %3193 = vmatpush1.bf16.msra.mxu0 %v6028_v11  ;;  %v2895_v11 = vadd.f32 %v7244_v38, %v7174_v53 }
 0x1e3   : > { %3234 = vmatpush1.bf16.msra.mxu1 %v6031_v12  ;;  %3194 = vmatprep.subr.bf16.mxu0 %v6036_v15  ;;  %v2897_v12 = vadd.f32 %v7252_v5, %v7180_v60 }
 0x1e4   : > { %3235 = vmatprep.subr.bf16.mxu1 %v6039_v25  ;;  %v2936_v13 = vadd.f32 %v7246_v2, %v2895_v11 }
 0x1e5   : > { %v2938_v25 = vadd.f32 %v7254_v6, %v2897_v12 }
 0x1e6   : > { %3195 = vmatpush1.bf16.msra.mxu0 %v6034_v26 }
 0x1e7   : > { %3236 = vmatpush1.bf16.msra.mxu1 %v6037_v16  ;;  %3196 = vmatprep.subr.bf16.mxu0 %v6042_v19  ;;  %v422_v16 = vld [vmem:[#allocation2 + $0x10] sm:$0xff] }
 0x1e8   : > { %3237 = vmatprep.subr.bf16.mxu1 %v6045_v20 }
 0x1ea   : > { %3197 = vmatpush1.bf16.msra.mxu0 %v6040_v21  ;;  %v423_v21 = vld [vmem:[#allocation2] sm:$0xff] }
 0x1eb   : > { %3238 = vmatpush1.bf16.msra.mxu1 %v6043_v22  ;;  %3198 = vmatprep.subr.bf16.mxu0 %v6048_v27 }
 0x1ec   : > { %3239 = vmatprep.subr.bf16.mxu1 %v6051_v28 }
 0x1ee   : > { %3199 = vmatpush1.bf16.msra.mxu0 %v6046_v29 }
 0x1ef   : > { %3240 = vmatpush1.bf16.msra.mxu1 %v6049_v30  ;;  %3200 = vmatprep.subr.bf16.mxu0 %v6054_v31 }
 0x1f0   : > { %3241 = vmatprep.subr.bf16.mxu1 %v6057_v32 }
 0x1f2   : > { %3201 = vmatpush1.bf16.msra.mxu0 %v6052_v33 }
 0x1f3   : > { %3242 = vmatpush1.bf16.msra.mxu1 %v6055_v34  ;;  %3202 = vmatprep.subr.bf16.mxu0 %v6060_v39 }
 0x1f4   : > { %3243 = vmatprep.subr.bf16.mxu1 %v6063_v40 }
 0x1f6   : > { %3203 = vmatpush1.bf16.msra.mxu0 %v6058_v41 }
 0x1f7   : > { %3244 = vmatpush1.bf16.msra.mxu1 %v6061_v42  ;;  %3204 = vmatprep.subr.bf16.mxu0 %v6066_v23 }
 0x1f8   : > { %3245 = vmatprep.subr.bf16.mxu1 %v6069_v24 }
 0x1fa   : > { %3205 = vmatpush2.bf16.msra.mxu0 %v6064_v43 }
 0x1fb   : > { %3246 = vmatpush2.bf16.msra.mxu1 %v6067_v44  ;;  %3206 = vmatprep.subr.bf16.mxu0 %v6072_v45 }
 0x1fc   : > { %3247 = vmatprep.subr.bf16.mxu1 %v6075_v46 }
 0x1fe   : > { %3207 = vmatpush2.bf16.msra.mxu0 %v6070_v47 }
 0x1ff   : > { %3248 = vmatpush2.bf16.msra.mxu1 %v6073_v49  ;;  %3208 = vmatprep.subr.bf16.mxu0 %v6078_v50 }
 0x200   : > { %3249 = vmatprep.subr.bf16.mxu1 %v6081_v48 }
 0x202   : > { %3209 = vmatpush2.bf16.msra.mxu0 %v6076_v52 }
 0x203   : > { %3250 = vmatpush2.bf16.msra.mxu1 %v6079_v51  ;;  %3210 = vmatprep.subr.bf16.mxu0 %v6084_v54 }
 0x204   : > { %3251 = vmatprep.subr.bf16.mxu1 %v6087_v55  ;;  %v424_v55 = vld [vmem:[#allocation2 + $0x18] sm:$0xff] }
 0x206   : > { %3211 = vmatpush2.bf16.msra.mxu0 %v6082_v56 }
 0x207   : > { %3252 = vmatpush2.bf16.msra.mxu1 %v6085_v57  ;;  %3212 = vmatprep.subr.bf16.mxu0 %v6090_v58 }
 0x208   : > { %3253 = vmatprep.subr.bf16.mxu1 %v6093_v59 }
 0x20a   : > { %3213 = vmatpush2.bf16.msra.mxu0 %v6088_v7  ;;  %v425_v7 = vld [vmem:[#allocation2 + $0x8] sm:$0xff] }
 0x20b   : > { %3254 = vmatpush2.bf16.msra.mxu1 %v6091_v8  ;;  %3214 = vmatprep.subr.bf16.mxu0 %v6096_v61 }
 0x20c   : > { %3255 = vmatprep.subr.bf16.mxu1 %v6099_v62 }
 0x20e   : > { %3215 = vmatpush2.bf16.msra.mxu0 %v6094_v63 }
 0x20f   : > { %3256 = vmatpush2.bf16.msra.mxu1 %v6097_v0  ;;  %3216 = vmatprep.subr.bf16.mxu0 %v6102_v1 }
 0x210   : > { %3257 = vmatprep.subr.bf16.mxu1 %v6105_v37 }
 0x212   : > { %3217 = vmatpush2.bf16.msra.mxu0 %v6100_v3 }
 0x213   : > { %3258 = vmatpush2.bf16.msra.mxu1 %v6103_v4  ;;  %3218 = vmatprep.subr.bf16.mxu0 %v6108_v9 }
 0x214   : > { %3259 = vmatprep.subr.bf16.mxu1 %v6111_v10 }
 0x216   : > { %3219 = vmatpush2.bf16.msra.mxu0 %v6106_v17 }
 0x217   : > { %3260 = vmatpush2.bf16.msra.mxu1 %v6109_v18 }
 0x219   : > { %v2976_v14 = vpop.f32.mrf.mxu0  ;;  %3221 = vmatmul.mubr.bf16.vlgmr.msra.gmra.mxu0 %v7094_v35 }
 0x21a   : > { %v3017_v15 = vpop.f32.mrf.mxu1  ;;  %3262 = vmatmul.mubr.bf16.vlgmr.msra.gmra.mxu1 %v7098_v36  ;;  %v2977_v26 = vadd.f32 %v2976_v14, %v2936_v13 }
 0x21b   : > { %v2978_v19 = vpop.f32.mrf.mxu0 }
 0x21c   : > { %v3019_v20 = vpop.f32.mrf.mxu1  ;;  %v3018_v53 = vadd.f32 %v3017_v15, %v2977_v26  ;;  %v2979_v38 = vadd.f32 %v2978_v19, %v2938_v25 }
 0x21d   : > { %v2980_v60 = vpop.f32.mrf.mxu0 }
 0x21e   : > { %v3021_v5 = vpop.f32.mrf.mxu1  ;;  %v3270_v22 = vadd.f32 %v3018_v53, %v422_v16  ;;  %v3020_v27 = vadd.f32 %v3019_v20, %v2979_v38 }
 0x21f   : > { %v2981_v2 = vpop.f32.mrf.mxu0 }
 0x220   : > { %v3022_v28 = vpop.f32.mrf.mxu1  ;;  %3274 = vst [vmem:[#allocation2 + $0x10] sm:$0xff] %v3270_v22  ;;  %v3271_v29 = vadd.f32 %v3020_v27, %v423_v21 }
 0x222   : > { %3275 = vst [vmem:[#allocation2] sm:$0xff] %v3271_v29 }
 0x259   : > { %v3058_v35 = vpop.f32.mrf.mxu0 }
 0x25a   : > { %v3099_v36 = vpop.f32.mrf.mxu1 }
 0x25b   : > { %v3100_v30 = vadd.f32 %v3099_v36, %v3058_v35  ;;  %v3060_v6 = vpop.f32.mrf.mxu0 }
 0x25c   : > { %v3101_v31 = vpop.f32.mrf.mxu1 }
 0x25d   : > { %v3102_v32 = vadd.f32 %v3101_v31, %v3060_v6  ;;  %v3062_v33 = vpop.f32.mrf.mxu0 }
 0x25e   : > { %v3103_v34 = vpop.f32.mrf.mxu1 }
 0x25f   : > { %v3063_v39 = vpop.f32.mrf.mxu0 }
 0x260   : > { %v3104_v40 = vpop.f32.mrf.mxu1 }
 0x299   : > { %v3140_v41 = vpop.f32.mrf.mxu0 }
 0x29a   : > { %v3181_v42 = vpop.f32.mrf.mxu1  ;;  %v3141_v47 = vadd.f32 %v3140_v41, %v3100_v30 }
 0x29b   : > { %v3142_v23 = vpop.f32.mrf.mxu0 }
 0x29c   : > { %v3183_v24 = vpop.f32.mrf.mxu1  ;;  %v3143_v49 = vadd.f32 %v3142_v23, %v3102_v32  ;;  %v3182_v50 = vadd.f32 %v3181_v42, %v3141_v47 }
 0x29d   : > { %v3144_v43 = vpop.f32.mrf.mxu0 }
 0x29e   : > { %v3185_v44 = vpop.f32.mrf.mxu1  ;;  %v3184_v51 = vadd.f32 %v3183_v24, %v3143_v49 }
 0x29f   : > { %v3145_v45 = vpop.f32.mrf.mxu0 }
 0x2a0   : > { %v3186_v46 = vpop.f32.mrf.mxu1 }
 0x2d9   : > { %v3222_v48 = vpop.f32.mrf.mxu0 }
 0x2da   : > { %v3263_v52 = vpop.f32.mrf.mxu1  ;;  %v3223_v54 = vadd.f32 %v3222_v48, %v3182_v50 }
 0x2db   : > { %v3224_v56 = vpop.f32.mrf.mxu0 }
 0x2dc   : > { %v3265_v57 = vpop.f32.mrf.mxu1  ;;  %v3264_v58 = vadd.f32 %v3263_v52, %v3223_v54  ;;  %v3225_v59 = vadd.f32 %v3224_v56, %v3184_v51 }
 0x2dd   : > { %v3226_v8 = vpop.f32.mrf.mxu0 }
 0x2de   : > { %v3267_v61 = vpop.f32.mrf.mxu1  ;;  %v3272_v62 = vadd.f32 %v3264_v58, %v424_v55  ;;  %v3266_v63 = vadd.f32 %v3265_v57, %v3225_v59  ;;  %3281 = sbr.rel (%p5183_p10) target bundleno = 1272 (0x4f8), region = 84 }
 0x2df   : > { %v3227_v0 = vpop.f32.mrf.mxu0 }
 0x2e0   : > { %v3268_v1 = vpop.f32.mrf.mxu1  ;;  %3276 = vst [vmem:[#allocation2 + $0x18] sm:$0xff] %v3272_v62  ;;  %v3273_v37 = vadd.f32 %v3266_v63, %v425_v7 }
 0x2e2   : > { %3277 = vst [vmem:[#allocation2 + $0x8] sm:$0xff] %v3273_v37 }
 0x2e3   : > { %v6112_v3 = vld [vmem:[#allocation9 + $0xe4] ss:$16 sps:$4 sm:$0xff]   ;;  %v6116_v9 = vld [vmem:[#allocation9 + $0xe0] ss:$16 sps:$4 sm:$0xff]   ;;  %v3288_v42 = vlaneseq  ;;  %v3286_v56 = vld [vmem:[#allocation8] sm:$0xf] }
 0x2e4   : > { %v6114_v4 = vld [vmem:[#allocation9 + $0x2e4] ss:$16 sps:$4 sm:$0xff]   ;;  %4110 = vmatprep.subr.bf16.mxu0 %v6112_v3  ;;  %v6117_v10 = vld [vmem:[#allocation9 + $0x2e0] ss:$16 sps:$4 sm:$0xff]  }
 0x2e5   : > { %4151 = vmatprep.subr.bf16.mxu1 %v6114_v4  ;;  %v6118_v17 = vld [vmem:[#allocation9 + $0xc4] ss:$16 sps:$4 sm:$0xff]   ;;  %4111 = vmatpush1.bf16.msra.mxu0 %v6116_v9  ;;  %v6122_v11 = vld [vmem:[#allocation9 + $0xc0] ss:$16 sps:$4 sm:$0xff]   ;;  %v7323_v45 = vshrl.u32 %v3288_v42, 7 }
 0x2e6   : > { %4152 = vmatpush1.bf16.msra.mxu1 %v6117_v10  ;;  %v6120_v18 = vld [vmem:[#allocation9 + $0x2c4] ss:$16 sps:$4 sm:$0xff]   ;;  %4112 = vmatprep.subr.bf16.mxu0 %v6118_v17  ;;  %v6123_v12 = vld [vmem:[#allocation9 + $0x2c0] ss:$16 sps:$4 sm:$0xff]   ;;  %v6220_v42 = vld [vmem:[#allocation9 + $0xa8] ss:$16 sps:$4 sm:$0xff]  }
 0x2e7   : > { %4153 = vmatprep.subr.bf16.mxu1 %v6120_v18  ;;  %v6124_v13 = vld [vmem:[#allocation9 + $0xa4] ss:$16 sps:$4 sm:$0xff]   ;;  %v6128_v15 = vld [vmem:[#allocation9 + $0xa0] ss:$16 sps:$4 sm:$0xff]   ;;  %v3294_v48 = vsub.s32 1, %v7323_v45  ;;  %v3302_v52 = vsub.s32 3, %v7323_v45 }
 0x2e8   : > { %v6126_v14 = vld [vmem:[#allocation9 + $0x2a4] ss:$16 sps:$4 sm:$0xff]   ;;  %v6129_v25 = vld [vmem:[#allocation9 + $0x2a0] ss:$16 sps:$4 sm:$0xff]   ;;  %v3290_v1 = vsub.s32 0, %v7323_v45  ;;  %v3298_v37 = vsub.s32 2, %v7323_v45 }
 0x2e9   : > { %4113 = vmatpush1.bf16.msra.mxu0 %v6122_v11  ;;  %v6130_v26 = vld [vmem:[#allocation9 + $0x84] ss:$16 sps:$4 sm:$0xff]   ;;  %v6134_v19 = vld [vmem:[#allocation9 + $0x80] ss:$16 sps:$4 sm:$0xff]   ;;  %v3295_v59 = vrot.slane %v3286_v56, %v3294_v48  ;;  %v3303_v7 = vrot.slane %v3286_v56, %v3302_v52 }
 0x2ea   : > { %4154 = vmatpush1.bf16.msra.mxu1 %v6123_v12  ;;  %4114 = vmatprep.subr.bf16.mxu0 %v6124_v13  ;;  %v6132_v16 = vld [vmem:[#allocation9 + $0x284] ss:$16 sps:$4 sm:$0xff]   ;;  %v6135_v20 = vld [vmem:[#allocation9 + $0x280] ss:$16 sps:$4 sm:$0xff]  }
 0x2eb   : > { %4155 = vmatprep.subr.bf16.mxu1 %v6126_v14  ;;  %v6136_v53 = vld [vmem:[#allocation9 + $0x64] ss:$16 sps:$4 sm:$0xff]   ;;  %v6140_v21 = vld [vmem:[#allocation9 + $0x60] ss:$16 sps:$4 sm:$0xff]   ;;  %v3291_v14 = vrot.slane %v3286_v56, %v3290_v1 }
 0x2ec   : > { %v6138_v38 = vld [vmem:[#allocation9 + $0x264] ss:$16 sps:$4 sm:$0xff]   ;;  %v6141_v60 = vld [vmem:[#allocation9 + $0x260] ss:$16 sps:$4 sm:$0xff]  }
 0x2ed   : > { %4115 = vmatpush1.bf16.msra.mxu0 %v6128_v15  ;;  %v6142_v5 = vld [vmem:[#allocation9 + $0x44] ss:$16 sps:$4 sm:$0xff]   ;;  %v6146_v27 = vld [vmem:[#allocation9 + $0x40] ss:$16 sps:$4 sm:$0xff]   ;;  %v3299_v15 = vrot.slane %v3286_v56, %v3298_v37  ;;  %v6238_v56 = vld [vmem:[#allocation9 + $0x48] ss:$16 sps:$4 sm:$0xff]  }
 0x2ee   : > { %4156 = vmatpush1.bf16.msra.mxu1 %v6129_v25  ;;  %4116 = vmatprep.subr.bf16.mxu0 %v6130_v26  ;;  %v6144_v22 = vld [vmem:[#allocation9 + $0x244] ss:$16 sps:$4 sm:$0xff]   ;;  %v6147_v2 = vld [vmem:[#allocation9 + $0x240] ss:$16 sps:$4 sm:$0xff]  }
 0x2ef   : > { %4157 = vmatprep.subr.bf16.mxu1 %v6132_v16  ;;  %v6148_v28 = vld [vmem:[#allocation9 + $0x24] ss:$16 sps:$4 sm:$0xff]   ;;  %v6152_v35 = vld [vmem:[#allocation9 + $0x20] ss:$16 sps:$4 sm:$0xff]  }
 0x2f0   : > { %v6150_v29 = vld [vmem:[#allocation9 + $0x224] ss:$16 sps:$4 sm:$0xff]   ;;  %v6153_v36 = vld [vmem:[#allocation9 + $0x220] ss:$16 sps:$4 sm:$0xff]  }
 0x2f1   : > { %4117 = vmatpush1.bf16.msra.mxu0 %v6134_v19  ;;  %v6154_v30 = vld [vmem:[#allocation9 + $0x4] ss:$16 sps:$4 sm:$0xff]   ;;  %v6158_v31 = vld [vmem:[#allocation9] ss:$16 sps:$4 sm:$0xff]  }
 0x2f2   : > { %4158 = vmatpush1.bf16.msra.mxu1 %v6135_v20  ;;  %4118 = vmatprep.subr.bf16.mxu0 %v6136_v53  ;;  %v6156_v6 = vld [vmem:[#allocation9 + $0x204] ss:$16 sps:$4 sm:$0xff]   ;;  %v6159_v32 = vld [vmem:[#allocation9 + $0x200] ss:$16 sps:$4 sm:$0xff]  }
 0x2f3   : > { %4159 = vmatprep.subr.bf16.mxu1 %v6138_v38  ;;  %v6160_v33 = vld [vmem:[#allocation9 + $0x1e4] ss:$16 sps:$4 sm:$0xff]   ;;  %v6164_v39 = vld [vmem:[#allocation9 + $0x1e0] ss:$16 sps:$4 sm:$0xff]  }
 0x2f4   : > { %v6162_v34 = vld [vmem:[#allocation9 + $0x3e4] ss:$16 sps:$4 sm:$0xff]   ;;  %v6165_v40 = vld [vmem:[#allocation9 + $0x3e0] ss:$16 sps:$4 sm:$0xff]  }
 0x2f5   : > { %4119 = vmatpush1.bf16.msra.mxu0 %v6140_v21  ;;  %v6166_v41 = vld [vmem:[#allocation9 + $0x1c4] ss:$16 sps:$4 sm:$0xff]   ;;  %v6170_v24 = vld [vmem:[#allocation9 + $0x1c0] ss:$16 sps:$4 sm:$0xff]  }
 0x2f6   : > { %4160 = vmatpush1.bf16.msra.mxu1 %v6141_v60  ;;  %4120 = vmatprep.subr.bf16.mxu0 %v6142_v5  ;;  %v6168_v23 = vld [vmem:[#allocation9 + $0x3c4] ss:$16 sps:$4 sm:$0xff]   ;;  %v6171_v43 = vld [vmem:[#allocation9 + $0x3c0] ss:$16 sps:$4 sm:$0xff]  }
 0x2f7   : > { %4161 = vmatprep.subr.bf16.mxu1 %v6144_v22  ;;  %v6172_v44 = vld [vmem:[#allocation9 + $0x1a4] ss:$16 sps:$4 sm:$0xff]   ;;  %v6176_v47 = vld [vmem:[#allocation9 + $0x1a0] ss:$16 sps:$4 sm:$0xff]  }
 0x2f8   : > { %v6174_v46 = vld [vmem:[#allocation9 + $0x3a4] ss:$16 sps:$4 sm:$0xff]   ;;  %v6177_v49 = vld [vmem:[#allocation9 + $0x3a0] ss:$16 sps:$4 sm:$0xff]  }
 0x2f9   : > { %4121 = vmatpush1.bf16.msra.mxu0 %v6146_v27  ;;  %v6178_v50 = vld [vmem:[#allocation9 + $0x184] ss:$16 sps:$4 sm:$0xff]   ;;  %v6182_v54 = vld [vmem:[#allocation9 + $0x180] ss:$16 sps:$4 sm:$0xff]  }
 0x2fa   : > { %4162 = vmatpush1.bf16.msra.mxu1 %v6147_v2  ;;  %4122 = vmatprep.subr.bf16.mxu0 %v6148_v28  ;;  %v6180_v51 = vld [vmem:[#allocation9 + $0x384] ss:$16 sps:$4 sm:$0xff]   ;;  %v3283_v55 = vld [vmem:[#allocation2] sm:$0xff]  ;;  %v3282_v25 = vld [vmem:[#allocation2 + $0x10] sm:$0xff] }
 0x2fb   : > { %4163 = vmatprep.subr.bf16.mxu1 %v6150_v29  ;;  %v3285_v57 = vld [vmem:[#allocation2 + $0x8] sm:$0xff]  ;;  %v6183_v58 = vld [vmem:[#allocation9 + $0x380] ss:$16 sps:$4 sm:$0xff]   ;;  %v3309_v62 = vadd.f32 %v3295_v59, %v3283_v55  ;;  %v3284_v26 = vld [vmem:[#allocation2 + $0x18] sm:$0xff]  ;;  %v3308_v20 = vadd.f32 %v3291_v14, %v3282_v25 }
 0x2fc   : > { %v6184_v8 = vld [vmem:[#allocation9 + $0x164] ss:$16 sps:$4 sm:$0xff]   ;;  %v3311_v63 = vadd.f32 %v3303_v7, %v3285_v57  ;;  %v6188_v0 = vld [vmem:[#allocation9 + $0x160] ss:$16 sps:$4 sm:$0xff]   ;;  %v3310_v53 = vadd.f32 %v3299_v15, %v3284_v26  ;;  %v6210_v29 = vld [vmem:[#allocation9 + $0xec] ss:$16 sps:$4 sm:$0xff]  }
 0x2fd   : > { %4123 = vmatpush1.bf16.msra.mxu0 %v6152_v35  ;;  %v6186_v61 = vld [vmem:[#allocation9 + $0x364] ss:$16 sps:$4 sm:$0xff]   ;;  %v6189_v3 = vld [vmem:[#allocation9 + $0x360] ss:$16 sps:$4 sm:$0xff]   ;;  %v3313_v4 = vmax.f32 %v3309_v62, 0.0  ;;  %v3312_v22 = vmax.f32 %v3308_v20, 0.0 }
 0x2fe   : > { %4164 = vmatpush1.bf16.msra.mxu1 %v6153_v36  ;;  %4124 = vmatprep.subr.bf16.mxu0 %v6154_v30  ;;  %v3315_v9 = vmax.f32 %v3311_v63, 0.0  ;;  %v6190_v10 = vld [vmem:[#allocation9 + $0x144] ss:$16 sps:$4 sm:$0xff]   ;;  %v6194_v18 = vld [vmem:[#allocation9 + $0x140] ss:$16 sps:$4 sm:$0xff]   ;;  %v3314_v27 = vmax.f32 %v3310_v53, 0.0 }
 0x2ff   : > { %4165 = vmatprep.subr.bf16.mxu1 %v6156_v6  ;;  %v6192_v17 = vld [vmem:[#allocation9 + $0x344] ss:$16 sps:$4 sm:$0xff]   ;;  %v3317_v11 = vpack.c.bf16 %v3313_v4, %v3313_v4  ;;  %v6195_v13 = vld [vmem:[#allocation9 + $0x340] ss:$16 sps:$4 sm:$0xff]   ;;  %v6213_v35 = vld [vmem:[#allocation9 + $0x2ec] ss:$16 sps:$4 sm:$0xff]   ;;  %v7337_v36 = vpack.c.bf16 %v3312_v22, %v3312_v22 }
 0x300   : > { %v3319_v12 = vpack.c.bf16 %v3315_v9, %v3315_v9  ;;  %v6196_v16 = vld [vmem:[#allocation9 + $0x124] ss:$16 sps:$4 sm:$0xff]   ;;  %v6200_v38 = vld [vmem:[#allocation9 + $0x120] ss:$16 sps:$4 sm:$0xff]   ;;  %v7339_v30 = vpack.c.bf16 %v3314_v27, %v3314_v27  ;;  %v6208_v6 = vld [vmem:[#allocation9 + $0xe8] ss:$16 sps:$4 sm:$0xff]  }
 0x301   : > { %4125 = vmatpush1.bf16.msra.mxu0 %v6158_v31  ;;  %v6198_v19 = vld [vmem:[#allocation9 + $0x324] ss:$16 sps:$4 sm:$0xff]   ;;  %4142 = vmatprep.mubr.bf16.mxu0 %v3317_v11  ;;  %v6201_v21 = vld [vmem:[#allocation9 + $0x320] ss:$16 sps:$4 sm:$0xff]   ;;  %v6211_v31 = vld [vmem:[#allocation9 + $0x2e8] ss:$16 sps:$4 sm:$0xff]  }
 0x302   : > { %4166 = vmatpush1.bf16.msra.mxu1 %v6159_v32  ;;  %4126 = vmatprep.subr.bf16.mxu0 %v6160_v33  ;;  %v6202_v60 = vld [vmem:[#allocation9 + $0x104] ss:$16 sps:$4 sm:$0xff]   ;;  %v6206_v2 = vld [vmem:[#allocation9 + $0x100] ss:$16 sps:$4 sm:$0xff]   ;;  %v6216_v32 = vld [vmem:[#allocation9 + $0xcc] ss:$16 sps:$4 sm:$0xff]  }
 0x303   : > { %4167 = vmatprep.subr.bf16.mxu1 %v6162_v34  ;;  %4183 = vmatprep.mubr.bf16.mxu1 %v3319_v12  ;;  %v6204_v5 = vld [vmem:[#allocation9 + $0x304] ss:$16 sps:$4 sm:$0xff]   ;;  %v6207_v28 = vld [vmem:[#allocation9 + $0x300] ss:$16 sps:$4 sm:$0xff]   ;;  %v6219_v33 = vld [vmem:[#allocation9 + $0x2cc] ss:$16 sps:$4 sm:$0xff]  }
 0x304   : > { %v6214_v34 = vld [vmem:[#allocation9 + $0xc8] ss:$16 sps:$4 sm:$0xff]   ;;  %v6243_v55 = vld [vmem:[#allocation9 + $0x24c] ss:$16 sps:$4 sm:$0xff]  }
 0x305   : > { %4127 = vmatpush2.bf16.msra.mxu0 %v6164_v39  ;;  %v6217_v39 = vld [vmem:[#allocation9 + $0x2c8] ss:$16 sps:$4 sm:$0xff]   ;;  %v6249_v59 = vld [vmem:[#allocation9 + $0x22c] ss:$16 sps:$4 sm:$0xff]  }
 0x306   : > { %4168 = vmatpush2.bf16.msra.mxu1 %v6165_v40  ;;  %4128 = vmatprep.subr.bf16.mxu0 %v6166_v41  ;;  %v6222_v40 = vld [vmem:[#allocation9 + $0xac] ss:$16 sps:$4 sm:$0xff]   ;;  %v6241_v57 = vld [vmem:[#allocation9 + $0x248] ss:$16 sps:$4 sm:$0xff]  }
 0x307   : > { %4169 = vmatprep.subr.bf16.mxu1 %v6168_v23  ;;  %v6225_v41 = vld [vmem:[#allocation9 + $0x2ac] ss:$16 sps:$4 sm:$0xff]   ;;  %v6223_v23 = vld [vmem:[#allocation9 + $0x2a8] ss:$16 sps:$4 sm:$0xff]  }
 0x308   : > { %v6244_v7 = vld [vmem:[#allocation9 + $0x28] ss:$16 sps:$4 sm:$0xff]   ;;  %v6255_v62 = vld [vmem:[#allocation9 + $0x20c] ss:$16 sps:$4 sm:$0xff]  }
 0x309   : > { %4129 = vmatpush2.bf16.msra.mxu0 %v6170_v24  ;;  %v6228_v24 = vld [vmem:[#allocation9 + $0x8c] ss:$16 sps:$4 sm:$0xff]   ;;  %v6250_v63 = vld [vmem:[#allocation9 + $0x8] ss:$16 sps:$4 sm:$0xff]  }
 0x30a   : > { %4170 = vmatpush2.bf16.msra.mxu1 %v6171_v43  ;;  %4130 = vmatprep.subr.bf16.mxu0 %v6172_v44  ;;  %v6231_v43 = vld [vmem:[#allocation9 + $0x28c] ss:$16 sps:$4 sm:$0xff]   ;;  %v6226_v44 = vld [vmem:[#allocation9 + $0x88] ss:$16 sps:$4 sm:$0xff]  }
 0x30b   : > { %4171 = vmatprep.subr.bf16.mxu1 %v6174_v46  ;;  %v6229_v46 = vld [vmem:[#allocation9 + $0x288] ss:$16 sps:$4 sm:$0xff]   ;;  %v6261_v4 = vld [vmem:[#allocation9 + $0x3ec] ss:$16 sps:$4 sm:$0xff]  }
 0x30c   : > { %v6256_v9 = vld [vmem:[#allocation9 + $0x1e8] ss:$16 sps:$4 sm:$0xff]   ;;  %v6273_v14 = vld [vmem:[#allocation9 + $0x3ac] ss:$16 sps:$4 sm:$0xff]  }
 0x30d   : > { %4131 = vmatpush2.bf16.msra.mxu0 %v6176_v47  ;;  %v6234_v47 = vld [vmem:[#allocation9 + $0x6c] ss:$16 sps:$4 sm:$0xff]   ;;  %v6268_v15 = vld [vmem:[#allocation9 + $0x1a8] ss:$16 sps:$4 sm:$0xff]  }
 0x30e   : > { %4172 = vmatpush2.bf16.msra.mxu1 %v6177_v49  ;;  %4132 = vmatprep.subr.bf16.mxu0 %v6178_v50  ;;  %v6237_v49 = vld [vmem:[#allocation9 + $0x26c] ss:$16 sps:$4 sm:$0xff]   ;;  %v6232_v50 = vld [vmem:[#allocation9 + $0x68] ss:$16 sps:$4 sm:$0xff]  }
 0x30f   : > { %4173 = vmatprep.subr.bf16.mxu1 %v6180_v51  ;;  %v6235_v51 = vld [vmem:[#allocation9 + $0x268] ss:$16 sps:$4 sm:$0xff]   ;;  %v6276_v26 = vld [vmem:[#allocation9 + $0x18c] ss:$16 sps:$4 sm:$0xff]  }
 0x310   : > { %v6271_v25 = vld [vmem:[#allocation9 + $0x3a8] ss:$16 sps:$4 sm:$0xff]   ;;  %v6282_v53 = vld [vmem:[#allocation9 + $0x16c] ss:$16 sps:$4 sm:$0xff]  }
 0x311   : > { %4133 = vmatpush2.bf16.msra.mxu0 %v6182_v54  ;;  %v6240_v54 = vld [vmem:[#allocation9 + $0x4c] ss:$16 sps:$4 sm:$0xff]   ;;  %v6277_v20 = vld [vmem:[#allocation9 + $0x388] ss:$16 sps:$4 sm:$0xff]  }
 0x312   : > { %4174 = vmatpush2.bf16.msra.mxu1 %v6183_v58  ;;  %4134 = vmatprep.subr.bf16.mxu0 %v6184_v8  ;;  %v6246_v58 = vld [vmem:[#allocation9 + $0x2c] ss:$16 sps:$4 sm:$0xff]   ;;  %v6247_v8 = vld [vmem:[#allocation9 + $0x228] ss:$16 sps:$4 sm:$0xff]  }
 0x313   : > { %4175 = vmatprep.subr.bf16.mxu1 %v6186_v61  ;;  %v6252_v61 = vld [vmem:[#allocation9 + $0xc] ss:$16 sps:$4 sm:$0xff]   ;;  %v6286_v27 = vld [vmem:[#allocation9 + $0x148] ss:$16 sps:$4 sm:$0xff]  }
 0x314   : > { %v6291_v22 = vld [vmem:[#allocation9 + $0x34c] ss:$16 sps:$4 sm:$0xff]  }
 0x315   : > { %4135 = vmatpush2.bf16.msra.mxu0 %v6188_v0  ;;  %v6253_v0 = vld [vmem:[#allocation9 + $0x208] ss:$16 sps:$4 sm:$0xff]  }
 0x316   : > { %4176 = vmatpush2.bf16.msra.mxu1 %v6189_v3  ;;  %4136 = vmatprep.subr.bf16.mxu0 %v6190_v10  ;;  %v6258_v3 = vld [vmem:[#allocation9 + $0x1ec] ss:$16 sps:$4 sm:$0xff]   ;;  %v6259_v10 = vld [vmem:[#allocation9 + $0x3e8] ss:$16 sps:$4 sm:$0xff]  }
 0x317   : > { %4177 = vmatprep.subr.bf16.mxu1 %v6192_v17  ;;  %v6264_v17 = vld [vmem:[#allocation9 + $0x1cc] ss:$16 sps:$4 sm:$0xff]  }
 0x319   : > { %4137 = vmatpush2.bf16.msra.mxu0 %v6194_v18  ;;  %v6267_v18 = vld [vmem:[#allocation9 + $0x3cc] ss:$16 sps:$4 sm:$0xff]  }
 0x31a   : > { %4178 = vmatpush2.bf16.msra.mxu1 %v6195_v13  ;;  %4138 = vmatprep.subr.bf16.mxu0 %v6196_v16  ;;  %v6270_v13 = vld [vmem:[#allocation9 + $0x1ac] ss:$16 sps:$4 sm:$0xff]  }
 0x31b   : > { %4179 = vmatprep.subr.bf16.mxu1 %v6198_v19  ;;  %v6279_v16 = vld [vmem:[#allocation9 + $0x38c] ss:$16 sps:$4 sm:$0xff]   ;;  %v6274_v19 = vld [vmem:[#allocation9 + $0x188] ss:$16 sps:$4 sm:$0xff]  }
 0x31d   : > { %4139 = vmatpush2.bf16.msra.mxu0 %v6200_v38  ;;  %v6285_v38 = vld [vmem:[#allocation9 + $0x36c] ss:$16 sps:$4 sm:$0xff]  }
 0x31e   : > { %4180 = vmatpush2.bf16.msra.mxu1 %v6201_v21  ;;  %4140 = vmatprep.subr.bf16.mxu0 %v6202_v60  ;;  %v6280_v21 = vld [vmem:[#allocation9 + $0x168] ss:$16 sps:$4 sm:$0xff]  }
 0x31f   : > { %4181 = vmatprep.subr.bf16.mxu1 %v6204_v5  ;;  %v6283_v60 = vld [vmem:[#allocation9 + $0x368] ss:$16 sps:$4 sm:$0xff]   ;;  %v6288_v5 = vld [vmem:[#allocation9 + $0x14c] ss:$16 sps:$4 sm:$0xff]  }
 0x321   : > { %4141 = vmatpush2.bf16.msra.mxu0 %v6206_v2  ;;  %v6289_v2 = vld [vmem:[#allocation9 + $0x348] ss:$16 sps:$4 sm:$0xff]  }
 0x322   : > { %4182 = vmatpush2.bf16.msra.mxu1 %v6207_v28  ;;  %4192 = vmatprep.subr.bf16.mxu0 %v6210_v29  ;;  %v6294_v28 = vld [vmem:[#allocation9 + $0x12c] ss:$16 sps:$4 sm:$0xff]  }
 0x323   : > { %4233 = vmatprep.subr.bf16.mxu1 %v6213_v35  ;;  %v6297_v29 = vld [vmem:[#allocation9 + $0x32c] ss:$16 sps:$4 sm:$0xff]   ;;  %v6292_v35 = vld [vmem:[#allocation9 + $0x128] ss:$16 sps:$4 sm:$0xff]  }
 0x324   : > { %4143 = vmatmul.mubr.bf16.vlgmr.msra.gmra.mxu0 %v7337_v36 }
 0x325   : > { %4184 = vmatmul.mubr.bf16.vlgmr.msra.gmra.mxu1 %v7339_v30  ;;  %4193 = vmatpush1.bf16.msra.mxu0 %v6208_v6  ;;  %v6295_v6 = vld [vmem:[#allocation9 + $0x328] ss:$16 sps:$4 sm:$0xff]  }
 0x326   : > { %4234 = vmatpush1.bf16.msra.mxu1 %v6211_v31  ;;  %4194 = vmatprep.subr.bf16.mxu0 %v6216_v32  ;;  %v6300_v31 = vld [vmem:[#allocation9 + $0x10c] ss:$16 sps:$4 sm:$0xff]  }
 0x327   : > { %4235 = vmatprep.subr.bf16.mxu1 %v6219_v33  ;;  %4224 = vmatprep.mubr.bf16.mxu0 %v3317_v11  ;;  %v6262_v11 = vld [vmem:[#allocation9 + $0x1c8] ss:$16 sps:$4 sm:$0xff]   ;;  %v6303_v32 = vld [vmem:[#allocation9 + $0x30c] ss:$16 sps:$4 sm:$0xff]  }
 0x328   : > { %4265 = vmatprep.mubr.bf16.mxu1 %v3319_v12  ;;  %v6265_v12 = vld [vmem:[#allocation9 + $0x3c8] ss:$16 sps:$4 sm:$0xff]  }
 0x329   : > { %4195 = vmatpush1.bf16.msra.mxu0 %v6214_v34  ;;  %v6298_v33 = vld [vmem:[#allocation9 + $0x108] ss:$16 sps:$4 sm:$0xff]  }
 0x32a   : > { %4236 = vmatpush1.bf16.msra.mxu1 %v6217_v39  ;;  %4196 = vmatprep.subr.bf16.mxu0 %v6222_v40  ;;  %v6301_v34 = vld [vmem:[#allocation9 + $0x308] ss:$16 sps:$4 sm:$0xff]   ;;  %v6304_v39 = vld [vmem:[#allocation12 + $0x78] sm:$0xff]  }
 0x32b   : > { %4237 = vmatprep.subr.bf16.mxu1 %v6225_v41  ;;  %v6305_v40 = vld [vmem:[#allocation12 + $0x38] sm:$0xff]   ;;  %v6306_v41 = vld [vmem:[#allocation12 + $0x70] sm:$0xff]  }
 0x32d   : > { %4197 = vmatpush1.bf16.msra.mxu0 %v6220_v42  ;;  %v6307_v42 = vld [vmem:[#allocation12 + $0x30] sm:$0xff]  }
 0x32e   : > { %4238 = vmatpush1.bf16.msra.mxu1 %v6223_v23  ;;  %4198 = vmatprep.subr.bf16.mxu0 %v6228_v24  ;;  %v6308_v23 = vld [vmem:[#allocation12 + $0x68] sm:$0xff]  }
 0x32f   : > { %4239 = vmatprep.subr.bf16.mxu1 %v6231_v43  ;;  %v6309_v24 = vld [vmem:[#allocation12 + $0x28] sm:$0xff]   ;;  %v6310_v43 = vld [vmem:[#allocation12 + $0x60] sm:$0xff]  }
 0x331   : > { %4199 = vmatpush1.bf16.msra.mxu0 %v6226_v44  ;;  %v6311_v44 = vld [vmem:[#allocation12 + $0x20] sm:$0xff]  }
 0x332   : > { %4240 = vmatpush1.bf16.msra.mxu1 %v6229_v46  ;;  %4200 = vmatprep.subr.bf16.mxu0 %v6234_v47  ;;  %v6312_v46 = vld [vmem:[#allocation12 + $0x58] sm:$0xff]  }
 0x333   : > { %4241 = vmatprep.subr.bf16.mxu1 %v6237_v49  ;;  %v6320_v47 = vld [vmem:[#allocation12 + $0xf8] sm:$0xff]  }
 0x334   : > { %v6321_v49 = vld [vmem:[#allocation12 + $0xb8] sm:$0xff]  }
 0x335   : > { %4201 = vmatpush1.bf16.msra.mxu0 %v6232_v50  ;;  %v6322_v50 = vld [vmem:[#allocation12 + $0xf0] sm:$0xff]  }
 0x336   : > { %4242 = vmatpush1.bf16.msra.mxu1 %v6235_v51  ;;  %4202 = vmatprep.subr.bf16.mxu0 %v6240_v54  ;;  %v6313_v51 = vld [vmem:[#allocation12 + $0x18] sm:$0xff]   ;;  %v6324_v54 = vld [vmem:[#allocation12 + $0xe8] sm:$0xff]  }
 0x337   : > { %4243 = vmatprep.subr.bf16.mxu1 %v6243_v55  ;;  %v6315_v55 = vld [vmem:[#allocation12 + $0x10] sm:$0xff]  }
 0x339   : > { %4203 = vmatpush1.bf16.msra.mxu0 %v6238_v56  ;;  %v6316_v56 = vld [vmem:[#allocation12 + $0x48] sm:$0xff]  }
 0x33a   : > { %4244 = vmatpush1.bf16.msra.mxu1 %v6241_v57  ;;  %4204 = vmatprep.subr.bf16.mxu0 %v6246_v58  ;;  %v6325_v57 = vld [vmem:[#allocation12 + $0xa8] sm:$0xff]   ;;  %v6326_v58 = vld [vmem:[#allocation12 + $0xe0] sm:$0xff]  }
 0x33b   : > { %4245 = vmatprep.subr.bf16.mxu1 %v6249_v59  ;;  %v6317_v59 = vld [vmem:[#allocation12 + $0x8] sm:$0xff]  }
 0x33d   : > { %4205 = vmatpush1.bf16.msra.mxu0 %v6244_v7  ;;  %v6318_v7 = vld [vmem:[#allocation12 + $0x40] sm:$0xff]  }
 0x33e   : > { %4246 = vmatpush1.bf16.msra.mxu1 %v6247_v8  ;;  %4206 = vmatprep.subr.bf16.mxu0 %v6252_v61  ;;  %v6327_v8 = vld [vmem:[#allocation12 + $0xa0] sm:$0xff]   ;;  %v6328_v61 = vld [vmem:[#allocation12 + $0xd8] sm:$0xff]  }
 0x33f   : > { %4247 = vmatprep.subr.bf16.mxu1 %v6255_v62  ;;  %v6319_v62 = vld [vmem:[#allocation12] sm:$0xff]  }
 0x341   : > { %4207 = vmatpush1.bf16.msra.mxu0 %v6250_v63  ;;  %v6329_v63 = vld [vmem:[#allocation12 + $0x98] sm:$0xff]  }
 0x342   : > { %4248 = vmatpush1.bf16.msra.mxu1 %v6253_v0  ;;  %4208 = vmatprep.subr.bf16.mxu0 %v6258_v3  ;;  %v6330_v0 = vld [vmem:[#allocation12 + $0xd0] sm:$0xff]  }
 0x343   : > { %4249 = vmatprep.subr.bf16.mxu1 %v6261_v4  ;;  %v6331_v3 = vld [vmem:[#allocation12 + $0x90] sm:$0xff]   ;;  %v6332_v4 = vld [vmem:[#allocation12 + $0xc8] sm:$0xff]  }
 0x345   : > { %4209 = vmatpush2.bf16.msra.mxu0 %v6256_v9  ;;  %v6333_v9 = vld [vmem:[#allocation12 + $0x88] sm:$0xff]  }
 0x346   : > { %4250 = vmatpush2.bf16.msra.mxu1 %v6259_v10  ;;  %4210 = vmatprep.subr.bf16.mxu0 %v6264_v17  ;;  %v6334_v10 = vld [vmem:[#allocation12 + $0xc0] sm:$0xff]  }
 0x347   : > { %4251 = vmatprep.subr.bf16.mxu1 %v6267_v18  ;;  %v6335_v17 = vld [vmem:[#allocation12 + $0x80] sm:$0xff]   ;;  %v3448_v18 = vld [vmem:[#allocation11] sm:$0xf] }
 0x349   : > { %4211 = vmatpush2.bf16.msra.mxu0 %v6262_v11  ;;  %v3453_v11 = vrot.slane %v3448_v18, %v3290_v1  ;;  %v3465_v1 = vrot.slane %v3448_v18, %v3302_v52 }
 0x34a   : > { %4252 = vmatpush2.bf16.msra.mxu1 %v6265_v12  ;;  %4212 = vmatprep.subr.bf16.mxu0 %v6270_v13  ;;  %v3457_v12 = vrot.slane %v3448_v18, %v3294_v48  ;;  %v3461_v48 = vrot.slane %v3448_v18, %v3298_v37 }
 0x34b   : > { %4253 = vmatprep.subr.bf16.mxu1 %v6273_v14 }
 0x34d   : > { %4213 = vmatpush2.bf16.msra.mxu0 %v6268_v15 }
 0x34e   : > { %4254 = vmatpush2.bf16.msra.mxu1 %v6271_v25  ;;  %4214 = vmatprep.subr.bf16.mxu0 %v6276_v26 }
 0x34f   : > { %4255 = vmatprep.subr.bf16.mxu1 %v6279_v16 }
 0x351   : > { %4215 = vmatpush2.bf16.msra.mxu0 %v6274_v19 }
 0x352   : > { %4256 = vmatpush2.bf16.msra.mxu1 %v6277_v20  ;;  %4216 = vmatprep.subr.bf16.mxu0 %v6282_v53 }
 0x353   : > { %4257 = vmatprep.subr.bf16.mxu1 %v6285_v38 }
 0x355   : > { %4217 = vmatpush2.bf16.msra.mxu0 %v6280_v21 }
 0x356   : > { %4258 = vmatpush2.bf16.msra.mxu1 %v6283_v60  ;;  %4218 = vmatprep.subr.bf16.mxu0 %v6288_v5 }
 0x357   : > { %4259 = vmatprep.subr.bf16.mxu1 %v6291_v22 }
 0x359   : > { %4219 = vmatpush2.bf16.msra.mxu0 %v6286_v27 }
 0x35a   : > { %4260 = vmatpush2.bf16.msra.mxu1 %v6289_v2  ;;  %4220 = vmatprep.subr.bf16.mxu0 %v6294_v28 }
 0x35b   : > { %4261 = vmatprep.subr.bf16.mxu1 %v6297_v29 }
 0x35d   : > { %4221 = vmatpush2.bf16.msra.mxu0 %v6292_v35 }
 0x35e   : > { %4262 = vmatpush2.bf16.msra.mxu1 %v6295_v6  ;;  %4222 = vmatprep.subr.bf16.mxu0 %v6300_v31 }
 0x35f   : > { %4263 = vmatprep.subr.bf16.mxu1 %v6303_v32 }
 0x361   : > { %4223 = vmatpush2.bf16.msra.mxu0 %v6298_v33 }
 0x362   : > { %4264 = vmatpush2.bf16.msra.mxu1 %v6301_v34  ;;  %5353 = vmatprep.subr.bf16.mxu0 %v6304_v39 }
 0x363   : > { %5375 = vmatprep.subr.bf16.mxu1 %v6320_v47 }
 0x364   : > { %4225 = vmatmul.mubr.bf16.vlgmr.msra.gmra.mxu0 %v7337_v36  ;;  %v6314_v36 = vld [vmem:[#allocation12 + $0x50] sm:$0xff]  }
 0x365   : > { %4266 = vmatmul.mubr.bf16.vlgmr.msra.gmra.mxu1 %v7339_v30  ;;  %5354 = vmatpush3.bf16.msra.mxu0 %v6305_v40  ;;  %v6323_v30 = vld [vmem:[#allocation12 + $0xb0] sm:$0xff]  }
 0x366   : > { %5355 = vmatprep.subr.bf16.mxu0 %v6306_v41  ;;  %5376 = vmatpush3.bf16.msra.mxu1 %v6321_v49  ;;  %v5312_v49 = vld [vmem:[#allocation14] ss:$0 sm:$0xff] }
 0x367   : > { %5377 = vmatprep.subr.bf16.mxu1 %v6322_v50 }
 0x369   : > { %5356 = vmatpush3.bf16.msra.mxu0 %v6307_v42 }
 0x36a   : > { %5357 = vmatprep.subr.bf16.mxu0 %v6308_v23  ;;  %5378 = vmatpush3.bf16.msra.mxu1 %v6323_v30 }
 0x36b   : > { %5379 = vmatprep.subr.bf16.mxu1 %v6324_v54 }
 0x36d   : > { %5358 = vmatpush3.bf16.msra.mxu0 %v6309_v24 }
 0x36e   : > { %5359 = vmatprep.subr.bf16.mxu0 %v6310_v43  ;;  %5380 = vmatpush3.bf16.msra.mxu1 %v6325_v57 }
 0x36f   : > { %5381 = vmatprep.subr.bf16.mxu1 %v6326_v58 }
 0x371   : > { %5360 = vmatpush3.bf16.msra.mxu0 %v6311_v44 }
 0x372   : > { %5361 = vmatprep.subr.bf16.mxu0 %v6312_v46  ;;  %5382 = vmatpush3.bf16.msra.mxu1 %v6327_v8 }
 0x373   : > { %5383 = vmatprep.subr.bf16.mxu1 %v6328_v61 }
 0x375   : > { %5362 = vmatpush3.bf16.msra.mxu0 %v6313_v51 }
 0x376   : > { %5363 = vmatprep.subr.bf16.mxu0 %v6314_v36  ;;  %5384 = vmatpush3.bf16.msra.mxu1 %v6329_v63 }
 0x377   : > { %5385 = vmatprep.subr.bf16.mxu1 %v6330_v0 }
 0x379   : > { %5364 = vmatpush3.bf16.msra.mxu0 %v6315_v55 }
 0x37a   : > { %5365 = vmatprep.subr.bf16.mxu0 %v6316_v56  ;;  %5386 = vmatpush3.bf16.msra.mxu1 %v6331_v3 }
 0x37b   : > { %5387 = vmatprep.subr.bf16.mxu1 %v6332_v4 }
 0x37d   : > { %5366 = vmatpush3.bf16.msra.mxu0 %v6317_v59 }
 0x37e   : > { %5367 = vmatprep.subr.bf16.mxu0 %v6318_v7  ;;  %5388 = vmatpush3.bf16.msra.mxu1 %v6333_v9 }
 0x37f   : > { %5389 = vmatprep.subr.bf16.mxu1 %v6334_v10 }
 0x381   : > { %5368 = vmatpush3.bf16.msra.mxu0 %v6319_v62 }
 0x382   : > { %5390 = vmatpush3.bf16.msra.mxu1 %v6335_v17 }
 0x3e4   : > { %v4144_v13 = vpop.f32.mrf.mxu0 }
 0x3e5   : > { %v4185_v14 = vpop.f32.mrf.mxu1  ;;  %v4145_v15 = vadd.f32 %v4144_v13, %v3453_v11 }
 0x3e6   : > { %v4146_v25 = vpop.f32.mrf.mxu0 }
 0x3e7   : > { %v4187_v26 = vpop.f32.mrf.mxu1  ;;  %v4186_v16 = vadd.f32 %v4185_v14, %v4145_v15  ;;  %v4147_v19 = vadd.f32 %v4146_v25, %v3457_v12 }
 0x3e8   : > { %v4148_v20 = vpop.f32.mrf.mxu0 }
 0x3e9   : > { %v4189_v53 = vpop.f32.mrf.mxu1  ;;  %v4188_v38 = vadd.f32 %v4187_v26, %v4147_v19  ;;  %v4274_v21 = vmax.f32 %v4186_v16, 0.0 }
 0x3ea   : > { %v4149_v60 = vpop.f32.mrf.mxu0 }
 0x3eb   : > { %v4190_v5 = vpop.f32.mrf.mxu1  ;;  %v4275_v22 = vmax.f32 %v4188_v38, 0.0  ;;  %v4278_v2 = vpack.c.bf16 %v4274_v21, %v4274_v21 }
 0x3ed   : > { %v4279_v27 = vpack.c.bf16 %v4275_v22, %v4275_v22 }
 0x3ef   : > { %4577 = vmatprep.mubr.bf16.mxu0 %v4279_v27 }
 0x3f0   : > { %4578 = vmatmul.mubr.bf16.vlgmr.msra.gmra.mxu0 %v4278_v2 }
 0x424   : > { %v4226_v28 = vpop.f32.mrf.mxu0 }
 0x425   : > { %v4267_v29 = vpop.f32.mrf.mxu1  ;;  %v4227_v35 = vadd.f32 %v4226_v28, %v3461_v48 }
 0x426   : > { %v4228_v6 = vpop.f32.mrf.mxu0 }
 0x427   : > { %v4269_v31 = vpop.f32.mrf.mxu1  ;;  %v4268_v32 = vadd.f32 %v4267_v29, %v4227_v35  ;;  %v4229_v33 = vadd.f32 %v4228_v6, %v3465_v1 }
 0x428   : > { %v4230_v34 = vpop.f32.mrf.mxu0 }
 0x429   : > { %v4271_v39 = vpop.f32.mrf.mxu1  ;;  %v4270_v40 = vadd.f32 %v4269_v31, %v4229_v33  ;;  %v4276_v41 = vmax.f32 %v4268_v32, 0.0 }
 0x42a   : > { %v4231_v42 = vpop.f32.mrf.mxu0 }
 0x42b   : > { %v4272_v23 = vpop.f32.mrf.mxu1  ;;  %v4277_v24 = vmax.f32 %v4270_v40, 0.0  ;;  %v4280_v44 = vpack.c.bf16 %v4276_v41, %v4276_v41 }
 0x42d   : > { %v4281_v43 = vpack.c.bf16 %v4277_v24, %v4277_v24 }
 0x42f   : > { %4617 = vmatprep.mubr.bf16.mxu1 %v4281_v43 }
 0x430   : > { %4618 = vmatmul.mubr.bf16.vlgmr.msra.gmra.mxu1 %v4280_v44 }
 0x4b0   : > { %v5369_v45 = vpop.f32.mrf.mxu0 }
 0x4b2   : > { %v5370_v52 = vpop.f32.mrf.mxu0 }
 0x4b3   : > { %v5371_v47 = vadd.f32 %v5370_v52, %v5369_v45 }
 0x4b4   : > { %v5372_v37 = vpop.f32.mrf.mxu0 }
 0x4b5   : > { %v4580_v36 = vadd.f32 %v5371_v47, %v5312_v49 }
 0x4b6   : > { %v5373_v46 = vpop.f32.mrf.mxu0 }
 0x4f0   : > { %v5391_v50 = vpop.f32.mrf.mxu1 }
 0x4f2   : > { %v5392_v51 = vpop.f32.mrf.mxu1 }
 0x4f3   : > { %v5393_v30 = vadd.f32 %v5392_v51, %v5391_v50 }
 0x4f4   : > { %v5394_v54 = vpop.f32.mrf.mxu1 }
 0x4f5   : > { %v4620_v55 = vadd.f32 %v5393_v30, %v4580_v36 }
 0x4f6   : > { %v5395_v56 = vpop.f32.mrf.mxu1 }
 0x4f7   : > { %4625 = vst [vmem:[#allocation15] sm:$0xff] %v4620_v55 }
 0x4f8 PF: > { %p5463_p1 = scmp.eq.s32.totalorder %s6702_s30, 1  ;;  %s6630_s27 = smov [#allocation15]  }
 0x4f9   : > { %s4635_s8 = sshll.u32 %s6630_s27, 4  ;;  %s4636_s8 = int_to_ptr.vmem [resolvable:$true] %s4635_s8 }
 0x4fa   : > { %s6522_s19 = scalar_lea.vmem %s4636_s8, 128  ;;  %p6529_p2 = scmp.lt.s32.totalorder %s4636_s8, %s4636_s8 }
 0x4fb   : > { %p6523_p11 = scmp.ne.s32.totalorder %s4636_s8, %s6522_s19  ;;  %p6530_p6 = scmp.lt.s32.totalorder %s6522_s19, %s6522_s19 }
 0x4fd   : > { %p6524_p13 = pnand %p6523_p11, %p5463_p1  ;;  %p6531_p5 = por %p6530_p6, %p6529_p2 }
 0x4ff   : > { %p6525_p0 = pneg %p6524_p13 }
 0x501   : > { %p6532_p12 = pnand %p6531_p5, %p6525_p0 }
 0x503   : > { %6535 = shalt.err (!%p6532_p12)
}
 0x504   : > { %5426 = dma.vmem_to_hbm [thread:$0]  (%p5463_p1), %s4636_s8, 128, %s7390_s7, [#allocation5]  }
 0x505   : > { %6591 = dma.done.wait (%p5463_p1), [#allocation5], 128  }
 0x506   : > { %6593 = vsyncadd (%p5463_p1), [#allocation5], 4294967168 }
 0x507 PF: > { %s26_s29 = sadd.s32 1, %s6616_s29   ;;  %s7416_s24 = smov %s6600_s25 }
 0x508   : > { %p23_p4 = scmp.ge.s32.totalorder %s26_s29, 4   ;;  %s7417_s25 = smov %s6604_s26 }
 0x509   : > { %s7418_s26 = smov %s6784_s9  ;;  %s7419_s27 = smov %s6612_s28 }
 0x50a   : > { %s7420_s28 = smov %s7422_s16  ;;  %25 = sbr.rel (!%p23_p4) target bundleno = 13 (0xd), region = 127 }
 0x50f   :  { %4648 = vsyncpa [#allocation4], 1 }
 0x510   :  { %4650 = vsyncpa [#allocation4 + $0x1], 1 }
 0x511   :  { %4651 = vsyncpa [#allocation7], 1 }
 0x512   :  { %4653 = vsyncpa [#allocation7 + $0x1], 1 }
 0x513   :  { %4654 = vsyncpa [#allocation10], 1 }
 0x514   :  { %4655 = vsyncpa [#allocation13], 1 }
 0x515   :  { %4656 = vsyncpa [#allocation5], 1 }
 0x516   :  { %4658 = vsyncpa [#allocation5 + $0x1], 1 }

</bundles_post_ra>
